<compile_context>
chip_gen: v7x
topology: tpu7x:2x2x1
jax: 0.10.0
libtpu: 0.0.40
codegen_flags: <defaults>
</compile_context>

<pallas_src>
import functools
import math

import numpy as np
import jax
import jax.numpy as jnp
from jax.experimental import pallas as pl
from jax.experimental.pallas import tpu as pltpu


# ----------------------------------------------------------------------------
# Pallas kernel: `bt` batch elements per grid step.
# ----------------------------------------------------------------------------
def _muse_kernel(h, d_k, dkp, dvp, nq, bt,
                 q_ref, k_ref, v_ref,                 # (bt, nq, 3*d_model) each
                 wq_ref, bq_ref,                      # (3dm, h*dkp), (1, h*dkp)
                 wk_ref, bk_ref,
                 wv_ref, bv_ref,                      # (3dm, h*dvp), (1, h*dvp)
                 dw3_w_ref, dw3_b_ref,                # (3, h*dvp), (1, h*dvp)
                 dw5_w_ref, dw5_b_ref,                # (5, h*dvp), (1, h*dvp)
                 wf_ref, bf_ref,                      # (4*h*dvp, dmp), (1, dmp)
                 o_ref):                              # (bt, nq, dmp)
    f32 = jnp.float32
    nt = bt * nq
    d3 = q_ref.shape[-1]

    q_in = q_ref[...].reshape(nt, d3)
    k_in = k_ref[...].reshape(nt, d3)
    v_in = v_ref[...].reshape(nt, d3)

    # --- fc_q / fc_k / fc_v (per-head widths lane-padded to dkp/dvp) ---------
    q_lin = jnp.dot(q_in, wq_ref[...], preferred_element_type=f32) + bq_ref[...]
    k_lin = jnp.dot(k_in, wk_ref[...], preferred_element_type=f32) + bk_ref[...]
    v_lin = jnp.dot(v_in, wv_ref[...], preferred_element_type=f32) + bv_ref[...]

    # --- multi-head scaled dot-product attention -----------------------------
    scale = 1.0 / math.sqrt(d_k)
    batch_rows = []
    for b in range(bt):                               # static, small
        r0 = b * nq
        heads = []
        for hi in range(h):                           # static, small
            qh = q_lin[r0:r0 + nq, hi * dkp:(hi + 1) * dkp]   # 128-aligned slices
            kh = k_lin[r0:r0 + nq, hi * dkp:(hi + 1) * dkp]
            vh = v_lin[r0:r0 + nq, hi * dvp:(hi + 1) * dvp]
            att = jax.lax.dot_general(qh, kh, (((1,), (1,)), ((), ())),
                                      preferred_element_type=f32) * scale
            att = att - jnp.max(att, axis=-1, keepdims=True)
            p = jnp.exp(att)
            denom = jnp.sum(p, axis=-1, keepdims=True)
            p = p * pl.reciprocal(denom, approx=True)          # EUP, not VPU divide
            # TODO(synk): nn.Dropout(p=0.1) on the attention matrix is identity (eval mode).
            heads.append(jnp.dot(p, vh, preferred_element_type=f32))   # (nq, dvp)
        batch_rows.append(heads[0] if h == 1 else jnp.concatenate(heads, axis=-1))
    oh_all = batch_rows[0] if bt == 1 else jnp.concatenate(batch_rows, axis=0)  # (nt, h*dvp)

    # --- depthwise convs on u = v_lin (zero-padded Conv1d), roll + edge mask --
    u = v_lin                                          # (nt, h*dvp)
    cdim = u.shape[-1]
    seq_pos = jax.lax.broadcasted_iota(jnp.int32, (nt, cdim), 0)
    if bt > 1:
        seq_pos = seq_pos % nq                         # position within each sequence

    def depthwise(dw_w_ref, dw_b_ref, kk):
        dw_w = dw_w_ref[...]                           # (kk, h*dvp)
        acc = jnp.zeros_like(u)
        for j in range(kk):
            s = j - kk // 2                            # out[t] needs u[t + s]
            if s == 0:
                shifted = u
            else:
                rolled = pltpu.roll(u, (-s) % nt, axis=0)      # XLU sublane rotate
                valid = (seq_pos + s >= 0) & (seq_pos + s < nq)
                shifted = jnp.where(valid, rolled, 0.0)        # zero padding at edges
            acc = acc + dw_w[j:j + 1, :] * shifted
        return acc + dw_b_ref[...]

    d3_out = depthwise(dw3_w_ref, dw3_b_ref, 3)
    d5_out = depthwise(dw5_w_ref, dw5_b_ref, 5)

    # --- fused fc_o + dy-weighted pointwise convs: one wide-K matmul ----------
    x_cat = jnp.concatenate([oh_all, u, d3_out, d5_out], axis=-1)   # (nt, 4*h*dvp)
    out = jnp.dot(x_cat, wf_ref[...], preferred_element_type=f32) + bf_ref[...]
    o_ref[...] = out.reshape(bt, nq, -1).astype(o_ref.dtype)


# ----------------------------------------------------------------------------
# Wrapper helpers: lane padding, batch blocking.
# ----------------------------------------------------------------------------
def _round_up(n, m):
    return ((n + m - 1) // m) * m


def _pad_head_cols(w, h, d, dp):
    """(..., h*d) -> (..., h*dp): each head's d columns zero-padded to dp."""
    if dp == d:
        return w
    lead = w.shape[:-1]
    w = w.reshape(lead + (h, d))
    pad = [(0, 0)] * len(lead) + [(0, 0), (0, dp - d)]
    return jnp.pad(w, pad).reshape(lead + (h * dp,))


def _pad_head_rows(w, h, d, dp):
    """(h*d, n) -> (h*dp, n): each head's d rows zero-padded to dp."""
    if dp == d:
        return w
    n = w.shape[-1]
    w = w.reshape(h, d, n)
    return jnp.pad(w, ((0, 0), (0, dp - d), (0, 0))).reshape(h * dp, n)


def _pad_last(w, n, n_pad):
    if n_pad == n:
        return w
    pad = [(0, 0)] * (w.ndim - 1) + [(0, n_pad - n)]
    return jnp.pad(w, pad)


def _pick_batch_block(b_s, nq, batch_block):
    if batch_block is not None:
        assert b_s % batch_block == 0, "batch_block must divide batch size"
        return batch_block
    best = 1
    for cand in range(1, b_s + 1):
        if b_s % cand != 0:
            continue
        if cand * nq > 128:                 # ~128 rows per block is plenty for MXU
            continue
        if b_s >= 2 and b_s // cand < 2:    # keep >=2 grid steps (2 TCs on v7x)
            continue
        best = cand
    return best


# ----------------------------------------------------------------------------
# Parameter init (matches the PyTorch module's init_weights) and wrapper.
# ----------------------------------------------------------------------------
def init_params(key, d_model, d_k, d_v, h):
    d3, hk, hv = 3 * d_model, h * d_k, h * d_v
    ks = jax.random.split(key, 16)
    f32 = jnp.float32
    p = {}
    # nn.Linear: weight ~ N(0, 0.001), bias = 0 (init_weights). Stored transposed (in, out).
    p["wq"] = 0.001 * jax.random.normal(ks[0], (d3, hk), f32)
    p["bq"] = jnp.zeros((1, hk), f32)
    p["wk"] = 0.001 * jax.random.normal(ks[1], (d3, hk), f32)
    p["bk"] = jnp.zeros((1, hk), f32)
    p["wv"] = 0.001 * jax.random.normal(ks[2], (d3, hv), f32)
    p["bv"] = jnp.zeros((1, hv), f32)
    p["wo"] = 0.001 * jax.random.normal(ks[3], (hv, d_model), f32)
    p["bo"] = jnp.zeros((1, d_model), f32)
    # Conv1d layers keep (deterministic) small-normal init, pre-transposed to matmul layout.
    p["pw1_w"] = 0.05 * jax.random.normal(ks[4], (hv, d_model), f32)
    p["pw1_b"] = 0.05 * jax.random.normal(ks[5], (1, d_model), f32)
    p["dw3_w"] = 0.05 * jax.random.normal(ks[6], (3, hv), f32)
    p["dw3_b"] = 0.05 * jax.random.normal(ks[7], (1, hv), f32)
    p["pw3_w"] = 0.05 * jax.random.normal(ks[8], (hv, d_model), f32)
    p["pw3_b"] = 0.05 * jax.random.normal(ks[9], (1, d_model), f32)
    p["dw5_w"] = 0.05 * jax.random.normal(ks[10], (5, hv), f32)
    p["dw5_b"] = 0.05 * jax.random.normal(ks[11], (1, hv), f32)
    p["pw5_w"] = 0.05 * jax.random.normal(ks[12], (hv, d_model), f32)
    p["pw5_b"] = 0.05 * jax.random.normal(ks[13], (1, d_model), f32)
    p["dy_paras"] = jnp.ones((3,), f32)
    return p


def muse_attention_pallas(queries, keys, values, params, *, h, d_k, d_v,
                          batch_block=None):
    b_s, nq = queries.shape[:2]
    q = queries.reshape(b_s, nq, -1).astype(jnp.float32)
    k = keys.reshape(b_s, nq, -1).astype(jnp.float32)
    v = values.reshape(b_s, nq, -1).astype(jnp.float32)
    d3 = q.shape[-1]
    d_model = d3 // 3

    # Lane padding so per-head slices and output stores are 128-lane aligned/dense.
    dkp = _round_up(d_k, 128)
    dvp = _round_up(d_v, 128)
    dmp = _round_up(d_model, 128)

    wq_p = _pad_head_cols(params["wq"], h, d_k, dkp)
    bq_p = _pad_head_cols(params["bq"], h, d_k, dkp)
    wk_p = _pad_head_cols(params["wk"], h, d_k, dkp)
    bk_p = _pad_head_cols(params["bk"], h, d_k, dkp)
    wv_p = _pad_head_cols(params["wv"], h, d_v, dvp)
    bv_p = _pad_head_cols(params["bv"], h, d_v, dvp)

    dw3_w_p = _pad_head_cols(params["dw3_w"], h, d_v, dvp)
    dw3_b_p = _pad_head_cols(params["dw3_b"], h, d_v, dvp)
    dw5_w_p = _pad_head_cols(params["dw5_w"], h, d_v, dvp)
    dw5_b_p = _pad_head_cols(params["dw5_b"], h, d_v, dvp)

    # Fused fc_o + dy-weighted pointwise convs; dy = softmax(dy_paras) and all
    # biases are folded here, in the wrapper (outside the kernel).
    dy = jax.nn.softmax(params["dy_paras"])
    wo_p = _pad_last(_pad_head_rows(params["wo"], h, d_v, dvp), d_model, dmp)
    pw1_p = _pad_last(_pad_head_rows(params["pw1_w"], h, d_v, dvp), d_model, dmp)
    pw3_p = _pad_last(_pad_head_rows(params["pw3_w"], h, d_v, dvp), d_model, dmp)
    pw5_p = _pad_last(_pad_head_rows(params["pw5_w"], h, d_v, dvp), d_model, dmp)
    w_fused = jnp.concatenate(
        [wo_p, dy[0] * pw1_p, dy[1] * pw3_p, dy[2] * pw5_p], axis=0)    # (4*h*dvp, dmp)
    b_fused = (_pad_last(params["bo"], d_model, dmp)
               + dy[0] * _pad_last(params["pw1_b"], d_model, dmp)
               + dy[1] * _pad_last(params["pw3_b"], d_model, dmp)
               + dy[2] * _pad_last(params["pw5_b"], d_model, dmp))      # (1, dmp)

    bt = _pick_batch_block(b_s, nq, batch_block)
    weights = [wq_p, bq_p, wk_p, bk_p, wv_p, bv_p,
               dw3_w_p, dw3_b_p, dw5_w_p, dw5_b_p, w_fused, b_fused]

    seq_spec = pl.BlockSpec((bt, nq, d3), lambda b: (b, 0, 0))
    # Constant weights: block index never changes across the grid, so they are
    # only DMA'd once (could also use pipeline_mode=pl.Buffered(1) to halve VMEM).
    weight_specs = [pl.BlockSpec(w.shape, lambda b, nd=w.ndim: (0,) * nd)
                    for w in weights]
    out_spec = pl.BlockSpec((bt, nq, dmp), lambda b: (b, 0, 0))

    kernel = functools.partial(_muse_kernel, h, d_k, dkp, dvp, nq, bt)
    out = pl.pallas_call(
        kernel,
        grid=(b_s // bt,),
        in_specs=[seq_spec, seq_spec, seq_spec] + weight_specs,
        out_specs=out_spec,
        out_shape=jax.ShapeDtypeStruct((b_s, nq, dmp), jnp.float32),
        compiler_params=pltpu.CompilerParams(
            dimension_semantics=("parallel",),
            vmem_limit_bytes=32 * 1024 * 1024),
    )(q, k, v, *weights)
    # Drop lane padding, then torch.unsqueeze(out, 2).
    return out[:, :, None, :d_model]


# ----------------------------------------------------------------------------
# Pure-JAX reference (mirrors the PyTorch forward, eval-mode dropout).
# ----------------------------------------------------------------------------
def muse_attention_ref(queries, keys, values, params, *, h, d_k, d_v):
    b_s, nq = queries.shape[:2]
    q = queries.reshape(b_s, nq, -1).astype(jnp.float32)
    k = keys.reshape(b_s, nq, -1).astype(jnp.float32)
    v = values.reshape(b_s, nq, -1).astype(jnp.float32)
    d3 = q.shape[-1]
    d_model = d3 // 3
    nk = nq
    qp = (q @ params["wq"] + params["bq"]).reshape(b_s, nq, h, d_k).transpose(0, 2, 1, 3)
    kp = (k @ params["wk"] + params["bk"]).reshape(b_s, nk, h, d_k).transpose(0, 2, 3, 1)
    vp = (v @ params["wv"] + params["bv"]).reshape(b_s, nk, h, d_v).transpose(0, 2, 1, 3)
    att = jnp.matmul(qp, kp) / np.sqrt(d_k)
    att = jax.nn.softmax(att, axis=-1)
    out = jnp.matmul(att, vp).transpose(0, 2, 1, 3).reshape(b_s, nq, h * d_v)
    out = out @ params["wo"] + params["bo"]
    v2 = vp.transpose(0, 1, 3, 2).reshape(b_s, h * d_v, nk)        # (B, C, L)
    dy = jax.nn.softmax(params["dy_paras"])

    def depth_pointwise(x, dw_w, dw_b, pw_w, pw_b, kk):
        L = x.shape[-1]
        if kk > 1:
            pad = kk // 2
            xp = jnp.pad(x, ((0, 0), (0, 0), (pad, pad)))
            y = jnp.zeros_like(x)
            for j in range(kk):
                y = y + dw_w[j][None, :, None] * xp[:, :, j:j + L]
            y = y + dw_b.reshape(1, -1, 1)
        else:
            y = x
        return jnp.einsum("bcl,cd->bdl", y, pw_w) + pw_b.reshape(1, -1, 1)

    c1 = depth_pointwise(v2, None, None, params["pw1_w"], params["pw1_b"], 1)
    c3 = depth_pointwise(v2, params["dw3_w"], params["dw3_b"],
                         params["pw3_w"], params["pw3_b"], 3)
    c5 = depth_pointwise(v2, params["dw5_w"], params["dw5_b"],
                         params["pw5_w"], params["pw5_b"], 5)
    out2 = dy[0] * c1 + dy[1] * c3 + dy[2] * c5                    # (B, dm, L)
    out = out + out2.transpose(0, 2, 1)
    return out[:, :, None, :]


if __name__ == "__main__":
    d_model, d_k, d_v, h = 4, 4, 4, 2
    b_s, nq = 2, 8

    key = jax.random.PRNGKey(0)
    kq, kk_, kv, kp = jax.random.split(key, 4)
    queries = jax.random.normal(kq, (b_s, nq, 3, d_model), jnp.float32)
    keys_ = jax.random.normal(kk_, (b_s, nq, 3, d_model), jnp.float32)
    values = jax.random.normal(kv, (b_s, nq, 3, d_model), jnp.float32)
    params = init_params(kp, d_model, d_k, d_v, h)

    out = muse_attention_pallas(queries, keys_, values, params, h=h, d_k=d_k, d_v=d_v)
    out = jax.block_until_ready(out)

    ref = muse_attention_ref(queries, keys_, values, params, h=h, d_k=d_k, d_v=d_v)
    assert out.shape == (b_s, nq, 1, d_model), out.shape
    if not np.allclose(np.asarray(out), np.asarray(ref), rtol=1e-3, atol=1e-5):
        raise AssertionError("Pallas kernel does not match pure-JAX reference")
    print("KERNEL_OK")
</pallas_src>

<mosaic_0001>
module attributes {stable_mosaic.version = 11 : i64} {
  func.func @_muse_kernel(%arg0: i32, %arg1: memref<1x8x12xf32, #tpu.memory_space<vmem>>, %arg2: memref<1x8x12xf32, #tpu.memory_space<vmem>>, %arg3: memref<1x8x12xf32, #tpu.memory_space<vmem>>, %arg4: memref<12x256xf32, #tpu.memory_space<vmem>>, %arg5: memref<1x256xf32, #tpu.memory_space<vmem>>, %arg6: memref<12x256xf32, #tpu.memory_space<vmem>>, %arg7: memref<1x256xf32, #tpu.memory_space<vmem>>, %arg8: memref<12x256xf32, #tpu.memory_space<vmem>>, %arg9: memref<1x256xf32, #tpu.memory_space<vmem>>, %arg10: memref<3x256xf32, #tpu.memory_space<vmem>>, %arg11: memref<1x256xf32, #tpu.memory_space<vmem>>, %arg12: memref<5x256xf32, #tpu.memory_space<vmem>>, %arg13: memref<1x256xf32, #tpu.memory_space<vmem>>, %arg14: memref<1024x128xf32, #tpu.memory_space<vmem>>, %arg15: memref<1x128xf32, #tpu.memory_space<vmem>>, %arg16: memref<1x8x128xf32, #tpu.memory_space<vmem>>) attributes {dimension_semantics = [#tpu.dimension_semantics<parallel>], iteration_bounds = array<i64: 2>, scalar_prefetch = 0 : i64, scratch_operands = 0 : i64, tpu.core_type = #tpu.core_type<tc>, window_params = [{transform_indices = @transform_0, window_bounds = array<i64: 1, 8, 12>}, {transform_indices = @transform_1, window_bounds = array<i64: 1, 8, 12>}, {transform_indices = @transform_2, window_bounds = array<i64: 1, 8, 12>}, {pipeline_mode = #tpu.pipeline_mode<synchronous>, transform_indices = @transform_3, window_bounds = array<i64: 12, 256>}, {pipeline_mode = #tpu.pipeline_mode<synchronous>, transform_indices = @transform_4, window_bounds = array<i64: 1, 256>}, {pipeline_mode = #tpu.pipeline_mode<synchronous>, transform_indices = @transform_5, window_bounds = array<i64: 12, 256>}, {pipeline_mode = #tpu.pipeline_mode<synchronous>, transform_indices = @transform_6, window_bounds = array<i64: 1, 256>}, {pipeline_mode = #tpu.pipeline_mode<synchronous>, transform_indices = @transform_7, window_bounds = array<i64: 12, 256>}, {pipeline_mode = #tpu.pipeline_mode<synchronous>, transform_indices = @transform_8, window_bounds = array<i64: 1, 256>}, {pipeline_mode = #tpu.pipeline_mode<synchronous>, transform_indices = @transform_9, window_bounds = array<i64: 3, 256>}, {pipeline_mode = #tpu.pipeline_mode<synchronous>, transform_indices = @transform_10, window_bounds = array<i64: 1, 256>}, {pipeline_mode = #tpu.pipeline_mode<synchronous>, transform_indices = @transform_11, window_bounds = array<i64: 5, 256>}, {pipeline_mode = #tpu.pipeline_mode<synchronous>, transform_indices = @transform_12, window_bounds = array<i64: 1, 256>}, {pipeline_mode = #tpu.pipeline_mode<synchronous>, transform_indices = @transform_13, window_bounds = array<i64: 1024, 128>}, {pipeline_mode = #tpu.pipeline_mode<synchronous>, transform_indices = @transform_14, window_bounds = array<i64: 1, 128>}, {transform_indices = @transform_15, window_bounds = array<i64: 1, 8, 128>}]} {
    %c0 = arith.constant 0 : index
    %c0_0 = arith.constant 0 : index
    %c0_1 = arith.constant 0 : index
    %0 = vector.load %arg1[%c0, %c0_0, %c0_1] : memref<1x8x12xf32, #tpu.memory_space<vmem>>, vector<1x8x12xf32>
    %1 = vector.shape_cast %0 : vector<1x8x12xf32> to vector<8x12xf32>
    %c0_2 = arith.constant 0 : index
    %c0_3 = arith.constant 0 : index
    %c0_4 = arith.constant 0 : index
    %2 = vector.load %arg2[%c0_2, %c0_3, %c0_4] : memref<1x8x12xf32, #tpu.memory_space<vmem>>, vector<1x8x12xf32>
    %3 = vector.shape_cast %2 : vector<1x8x12xf32> to vector<8x12xf32>
    %c0_5 = arith.constant 0 : index
    %c0_6 = arith.constant 0 : index
    %c0_7 = arith.constant 0 : index
    %4 = vector.load %arg3[%c0_5, %c0_6, %c0_7] : memref<1x8x12xf32, #tpu.memory_space<vmem>>, vector<1x8x12xf32>
    %5 = vector.shape_cast %4 : vector<1x8x12xf32> to vector<8x12xf32>
    %c0_8 = arith.constant 0 : index
    %c0_9 = arith.constant 0 : index
    %6 = vector.load %arg4[%c0_8, %c0_9] : memref<12x256xf32, #tpu.memory_space<vmem>>, vector<12x256xf32>
    %cst = arith.constant dense<0.000000e+00> : vector<8x256xf32>
    %7 = tpu.matmul %1, %6, %cst {dimension_numbers = #tpu.dot_dimension_numbers<[1], [0], [0], [1], [0, 0, 1, 1], [], []>} : vector<8x12xf32>, vector<12x256xf32>, vector<8x256xf32> -> vector<8x256xf32>
    %c0_10 = arith.constant 0 : index
    %c0_11 = arith.constant 0 : index
    %8 = vector.load %arg5[%c0_10, %c0_11] : memref<1x256xf32, #tpu.memory_space<vmem>>, vector<1x256xf32>
    %9 = vector.broadcast %8 : vector<1x256xf32> to vector<8x256xf32>
    %10 = arith.addf %7, %9 : vector<8x256xf32>
    %c0_12 = arith.constant 0 : index
    %c0_13 = arith.constant 0 : index
    %11 = vector.load %arg6[%c0_12, %c0_13] : memref<12x256xf32, #tpu.memory_space<vmem>>, vector<12x256xf32>
    %cst_14 = arith.constant dense<0.000000e+00> : vector<8x256xf32>
    %12 = tpu.matmul %3, %11, %cst_14 {dimension_numbers = #tpu.dot_dimension_numbers<[1], [0], [0], [1], [0, 0, 1, 1], [], []>} : vector<8x12xf32>, vector<12x256xf32>, vector<8x256xf32> -> vector<8x256xf32>
    %c0_15 = arith.constant 0 : index
    %c0_16 = arith.constant 0 : index
    %13 = vector.load %arg7[%c0_15, %c0_16] : memref<1x256xf32, #tpu.memory_space<vmem>>, vector<1x256xf32>
    %14 = vector.broadcast %13 : vector<1x256xf32> to vector<8x256xf32>
    %15 = arith.addf %12, %14 : vector<8x256xf32>
    %c0_17 = arith.constant 0 : index
    %c0_18 = arith.constant 0 : index
    %16 = vector.load %arg8[%c0_17, %c0_18] : memref<12x256xf32, #tpu.memory_space<vmem>>, vector<12x256xf32>
    %cst_19 = arith.constant dense<0.000000e+00> : vector<8x256xf32>
    %17 = tpu.matmul %5, %16, %cst_19 {dimension_numbers = #tpu.dot_dimension_numbers<[1], [0], [0], [1], [0, 0, 1, 1], [], []>} : vector<8x12xf32>, vector<12x256xf32>, vector<8x256xf32> -> vector<8x256xf32>
    %c0_20 = arith.constant 0 : index
    %c0_21 = arith.constant 0 : index
    %18 = vector.load %arg9[%c0_20, %c0_21] : memref<1x256xf32, #tpu.memory_space<vmem>>, vector<1x256xf32>
    %19 = vector.broadcast %18 : vector<1x256xf32> to vector<8x256xf32>
    %20 = arith.addf %17, %19 : vector<8x256xf32>
    %21 = vector.extract_strided_slice %10 {offsets = [0, 0], sizes = [8, 128], strides = [1, 1]} : vector<8x256xf32> to vector<8x128xf32>
    %22 = vector.extract_strided_slice %15 {offsets = [0, 0], sizes = [8, 128], strides = [1, 1]} : vector<8x256xf32> to vector<8x128xf32>
    %23 = vector.extract_strided_slice %20 {offsets = [0, 0], sizes = [8, 128], strides = [1, 1]} : vector<8x256xf32> to vector<8x128xf32>
    %cst_22 = arith.constant dense<0.000000e+00> : vector<8x8xf32>
    %24 = tpu.matmul %21, %22, %cst_22 {dimension_numbers = #tpu.dot_dimension_numbers<[1], [1], [0], [0], [0, 0, 1, 0], [], []>} : vector<8x128xf32>, vector<8x128xf32>, vector<8x8xf32> -> vector<8x8xf32>
    %cst_23 = arith.constant 5.000000e-01 : f32
    %25 = vector.broadcast %cst_23 : f32 to vector<8x8xf32>
    %26 = arith.mulf %24, %25 : vector<8x8xf32>
    %cst_24 = arith.constant dense<0xFF800000> : vector<8xf32>
    %27 = vector.multi_reduction <maximumf>, %26, %cst_24 [1] : vector<8x8xf32> to vector<8xf32>
    %28 = vector.shape_cast %27 : vector<8xf32> to vector<8x1xf32>
    %29 = vector.broadcast %28 : vector<8x1xf32> to vector<8x8xf32>
    %30 = arith.subf %26, %29 : vector<8x8xf32>
    %31 = math.exp %30 : vector<8x8xf32>
    %cst_25 = arith.constant dense<0.000000e+00> : vector<8xf32>
    %32 = vector.multi_reduction <add>, %31, %cst_25 [1] : vector<8x8xf32> to vector<8xf32>
    %33 = vector.shape_cast %32 : vector<8xf32> to vector<8x1xf32>
    %34 = tpu.reciprocal %33 {approx = true} : vector<8x1xf32> -> vector<8x1xf32>
    %35 = vector.broadcast %34 : vector<8x1xf32> to vector<8x8xf32>
    %36 = arith.mulf %31, %35 : vector<8x8xf32>
    %cst_26 = arith.constant dense<0.000000e+00> : vector<8x128xf32>
    %37 = tpu.matmul %36, %23, %cst_26 {dimension_numbers = #tpu.dot_dimension_numbers<[1], [0], [0], [1], [0, 0, 1, 1], [], []>} : vector<8x8xf32>, vector<8x128xf32>, vector<8x128xf32> -> vector<8x128xf32>
    %38 = vector.extract_strided_slice %10 {offsets = [0, 128], sizes = [8, 128], strides = [1, 1]} : vector<8x256xf32> to vector<8x128xf32>
    %39 = vector.extract_strided_slice %15 {offsets = [0, 128], sizes = [8, 128], strides = [1, 1]} : vector<8x256xf32> to vector<8x128xf32>
    %40 = vector.extract_strided_slice %20 {offsets = [0, 128], sizes = [8, 128], strides = [1, 1]} : vector<8x256xf32> to vector<8x128xf32>
    %cst_27 = arith.constant dense<0.000000e+00> : vector<8x8xf32>
    %41 = tpu.matmul %38, %39, %cst_27 {dimension_numbers = #tpu.dot_dimension_numbers<[1], [1], [0], [0], [0, 0, 1, 0], [], []>} : vector<8x128xf32>, vector<8x128xf32>, vector<8x8xf32> -> vector<8x8xf32>
    %cst_28 = arith.constant 5.000000e-01 : f32
    %42 = vector.broadcast %cst_28 : f32 to vector<8x8xf32>
    %43 = arith.mulf %41, %42 : vector<8x8xf32>
    %cst_29 = arith.constant dense<0xFF800000> : vector<8xf32>
    %44 = vector.multi_reduction <maximumf>, %43, %cst_29 [1] : vector<8x8xf32> to vector<8xf32>
    %45 = vector.shape_cast %44 : vector<8xf32> to vector<8x1xf32>
    %46 = vector.broadcast %45 : vector<8x1xf32> to vector<8x8xf32>
    %47 = arith.subf %43, %46 : vector<8x8xf32>
    %48 = math.exp %47 : vector<8x8xf32>
    %cst_30 = arith.constant dense<0.000000e+00> : vector<8xf32>
    %49 = vector.multi_reduction <add>, %48, %cst_30 [1] : vector<8x8xf32> to vector<8xf32>
    %50 = vector.shape_cast %49 : vector<8xf32> to vector<8x1xf32>
    %51 = tpu.reciprocal %50 {approx = true} : vector<8x1xf32> -> vector<8x1xf32>
    %52 = vector.broadcast %51 : vector<8x1xf32> to vector<8x8xf32>
    %53 = arith.mulf %48, %52 : vector<8x8xf32>
    %cst_31 = arith.constant dense<0.000000e+00> : vector<8x128xf32>
    %54 = tpu.matmul %53, %40, %cst_31 {dimension_numbers = #tpu.dot_dimension_numbers<[1], [0], [0], [1], [0, 0, 1, 1], [], []>} : vector<8x8xf32>, vector<8x128xf32>, vector<8x128xf32> -> vector<8x128xf32>
    %55 = tpu.concatenate %37, %54 in 1 : vector<8x128xf32>, vector<8x128xf32> -> vector<8x256xf32>
    %56 = tpu.iota {dimensions = array<i32: 0>} : vector<8x256xi32>
    %c0_32 = arith.constant 0 : index
    %c0_33 = arith.constant 0 : index
    %57 = vector.load %arg10[%c0_32, %c0_33] : memref<3x256xf32, #tpu.memory_space<vmem>>, vector<3x256xf32>
    %cst_34 = arith.constant 0.000000e+00 : f32
    %58 = vector.broadcast %cst_34 : f32 to vector<8x256xf32>
    %c1_i32 = arith.constant 1 : i32
    %59 = tpu.dynamic_rotate %20 by %c1_i32 dim 0 : vector<8x256xf32>, i32 -> vector<8x256xf32>
    %c-1_i32 = arith.constant -1 : i32
    %60 = vector.broadcast %c-1_i32 : i32 to vector<8x256xi32>
    %61 = arith.addi %56, %60 : vector<8x256xi32>
    %c0_i32 = arith.constant 0 : i32
    %62 = vector.broadcast %c0_i32 : i32 to vector<8x256xi32>
    %63 = arith.cmpi sge, %61, %62 : vector<8x256xi32>
    %c-1_i32_35 = arith.constant -1 : i32
    %64 = vector.broadcast %c-1_i32_35 : i32 to vector<8x256xi32>
    %65 = arith.addi %56, %64 : vector<8x256xi32>
    %c8_i32 = arith.constant 8 : i32
    %66 = vector.broadcast %c8_i32 : i32 to vector<8x256xi32>
    %67 = arith.cmpi slt, %65, %66 : vector<8x256xi32>
    %68 = arith.andi %63, %67 : vector<8x256xi1>
    %cst_36 = arith.constant 0.000000e+00 : f32
    %69 = vector.broadcast %cst_36 : f32 to vector<8x256xf32>
    %70 = arith.select %68, %59, %69 : vector<8x256xi1>, vector<8x256xf32>
    %71 = vector.extract_strided_slice %57 {offsets = [0, 0], sizes = [1, 256], strides = [1, 1]} : vector<3x256xf32> to vector<1x256xf32>
    %72 = vector.broadcast %71 : vector<1x256xf32> to vector<8x256xf32>
    %73 = arith.mulf %72, %70 : vector<8x256xf32>
    %74 = arith.addf %58, %73 : vector<8x256xf32>
    %75 = vector.extract_strided_slice %57 {offsets = [1, 0], sizes = [1, 256], strides = [1, 1]} : vector<3x256xf32> to vector<1x256xf32>
    %76 = vector.broadcast %75 : vector<1x256xf32> to vector<8x256xf32>
    %77 = arith.mulf %76, %20 : vector<8x256xf32>
    %78 = arith.addf %74, %77 : vector<8x256xf32>
    %c7_i32 = arith.constant 7 : i32
    %79 = tpu.dynamic_rotate %20 by %c7_i32 dim 0 : vector<8x256xf32>, i32 -> vector<8x256xf32>
    %c1_i32_37 = arith.constant 1 : i32
    %80 = vector.broadcast %c1_i32_37 : i32 to vector<8x256xi32>
    %81 = arith.addi %56, %80 : vector<8x256xi32>
    %c0_i32_38 = arith.constant 0 : i32
    %82 = vector.broadcast %c0_i32_38 : i32 to vector<8x256xi32>
    %83 = arith.cmpi sge, %81, %82 : vector<8x256xi32>
    %c1_i32_39 = arith.constant 1 : i32
    %84 = vector.broadcast %c1_i32_39 : i32 to vector<8x256xi32>
    %85 = arith.addi %56, %84 : vector<8x256xi32>
    %c8_i32_40 = arith.constant 8 : i32
    %86 = vector.broadcast %c8_i32_40 : i32 to vector<8x256xi32>
    %87 = arith.cmpi slt, %85, %86 : vector<8x256xi32>
    %88 = arith.andi %83, %87 : vector<8x256xi1>
    %cst_41 = arith.constant 0.000000e+00 : f32
    %89 = vector.broadcast %cst_41 : f32 to vector<8x256xf32>
    %90 = arith.select %88, %79, %89 : vector<8x256xi1>, vector<8x256xf32>
    %91 = vector.extract_strided_slice %57 {offsets = [2, 0], sizes = [1, 256], strides = [1, 1]} : vector<3x256xf32> to vector<1x256xf32>
    %92 = vector.broadcast %91 : vector<1x256xf32> to vector<8x256xf32>
    %93 = arith.mulf %92, %90 : vector<8x256xf32>
    %94 = arith.addf %78, %93 : vector<8x256xf32>
    %c0_42 = arith.constant 0 : index
    %c0_43 = arith.constant 0 : index
    %95 = vector.load %arg11[%c0_42, %c0_43] : memref<1x256xf32, #tpu.memory_space<vmem>>, vector<1x256xf32>
    %96 = vector.broadcast %95 : vector<1x256xf32> to vector<8x256xf32>
    %97 = arith.addf %94, %96 : vector<8x256xf32>
    %c0_44 = arith.constant 0 : index
    %c0_45 = arith.constant 0 : index
    %98 = vector.load %arg12[%c0_44, %c0_45] : memref<5x256xf32, #tpu.memory_space<vmem>>, vector<5x256xf32>
    %cst_46 = arith.constant 0.000000e+00 : f32
    %99 = vector.broadcast %cst_46 : f32 to vector<8x256xf32>
    %c2_i32 = arith.constant 2 : i32
    %100 = tpu.dynamic_rotate %20 by %c2_i32 dim 0 : vector<8x256xf32>, i32 -> vector<8x256xf32>
    %c-2_i32 = arith.constant -2 : i32
    %101 = vector.broadcast %c-2_i32 : i32 to vector<8x256xi32>
    %102 = arith.addi %56, %101 : vector<8x256xi32>
    %c0_i32_47 = arith.constant 0 : i32
    %103 = vector.broadcast %c0_i32_47 : i32 to vector<8x256xi32>
    %104 = arith.cmpi sge, %102, %103 : vector<8x256xi32>
    %c-2_i32_48 = arith.constant -2 : i32
    %105 = vector.broadcast %c-2_i32_48 : i32 to vector<8x256xi32>
    %106 = arith.addi %56, %105 : vector<8x256xi32>
    %c8_i32_49 = arith.constant 8 : i32
    %107 = vector.broadcast %c8_i32_49 : i32 to vector<8x256xi32>
    %108 = arith.cmpi slt, %106, %107 : vector<8x256xi32>
    %109 = arith.andi %104, %108 : vector<8x256xi1>
    %cst_50 = arith.constant 0.000000e+00 : f32
    %110 = vector.broadcast %cst_50 : f32 to vector<8x256xf32>
    %111 = arith.select %109, %100, %110 : vector<8x256xi1>, vector<8x256xf32>
    %112 = vector.extract_strided_slice %98 {offsets = [0, 0], sizes = [1, 256], strides = [1, 1]} : vector<5x256xf32> to vector<1x256xf32>
    %113 = vector.broadcast %112 : vector<1x256xf32> to vector<8x256xf32>
    %114 = arith.mulf %113, %111 : vector<8x256xf32>
    %115 = arith.addf %99, %114 : vector<8x256xf32>
    %c1_i32_51 = arith.constant 1 : i32
    %116 = tpu.dynamic_rotate %20 by %c1_i32_51 dim 0 : vector<8x256xf32>, i32 -> vector<8x256xf32>
    %c-1_i32_52 = arith.constant -1 : i32
    %117 = vector.broadcast %c-1_i32_52 : i32 to vector<8x256xi32>
    %118 = arith.addi %56, %117 : vector<8x256xi32>
    %c0_i32_53 = arith.constant 0 : i32
    %119 = vector.broadcast %c0_i32_53 : i32 to vector<8x256xi32>
    %120 = arith.cmpi sge, %118, %119 : vector<8x256xi32>
    %c-1_i32_54 = arith.constant -1 : i32
    %121 = vector.broadcast %c-1_i32_54 : i32 to vector<8x256xi32>
    %122 = arith.addi %56, %121 : vector<8x256xi32>
    %c8_i32_55 = arith.constant 8 : i32
    %123 = vector.broadcast %c8_i32_55 : i32 to vector<8x256xi32>
    %124 = arith.cmpi slt, %122, %123 : vector<8x256xi32>
    %125 = arith.andi %120, %124 : vector<8x256xi1>
    %cst_56 = arith.constant 0.000000e+00 : f32
    %126 = vector.broadcast %cst_56 : f32 to vector<8x256xf32>
    %127 = arith.select %125, %116, %126 : vector<8x256xi1>, vector<8x256xf32>
    %128 = vector.extract_strided_slice %98 {offsets = [1, 0], sizes = [1, 256], strides = [1, 1]} : vector<5x256xf32> to vector<1x256xf32>
    %129 = vector.broadcast %128 : vector<1x256xf32> to vector<8x256xf32>
    %130 = arith.mulf %129, %127 : vector<8x256xf32>
    %131 = arith.addf %115, %130 : vector<8x256xf32>
    %132 = vector.extract_strided_slice %98 {offsets = [2, 0], sizes = [1, 256], strides = [1, 1]} : vector<5x256xf32> to vector<1x256xf32>
    %133 = vector.broadcast %132 : vector<1x256xf32> to vector<8x256xf32>
    %134 = arith.mulf %133, %20 : vector<8x256xf32>
    %135 = arith.addf %131, %134 : vector<8x256xf32>
    %c7_i32_57 = arith.constant 7 : i32
    %136 = tpu.dynamic_rotate %20 by %c7_i32_57 dim 0 : vector<8x256xf32>, i32 -> vector<8x256xf32>
    %c1_i32_58 = arith.constant 1 : i32
    %137 = vector.broadcast %c1_i32_58 : i32 to vector<8x256xi32>
    %138 = arith.addi %56, %137 : vector<8x256xi32>
    %c0_i32_59 = arith.constant 0 : i32
    %139 = vector.broadcast %c0_i32_59 : i32 to vector<8x256xi32>
    %140 = arith.cmpi sge, %138, %139 : vector<8x256xi32>
    %c1_i32_60 = arith.constant 1 : i32
    %141 = vector.broadcast %c1_i32_60 : i32 to vector<8x256xi32>
    %142 = arith.addi %56, %141 : vector<8x256xi32>
    %c8_i32_61 = arith.constant 8 : i32
    %143 = vector.broadcast %c8_i32_61 : i32 to vector<8x256xi32>
    %144 = arith.cmpi slt, %142, %143 : vector<8x256xi32>
    %145 = arith.andi %140, %144 : vector<8x256xi1>
    %cst_62 = arith.constant 0.000000e+00 : f32
    %146 = vector.broadcast %cst_62 : f32 to vector<8x256xf32>
    %147 = arith.select %145, %136, %146 : vector<8x256xi1>, vector<8x256xf32>
    %148 = vector.extract_strided_slice %98 {offsets = [3, 0], sizes = [1, 256], strides = [1, 1]} : vector<5x256xf32> to vector<1x256xf32>
    %149 = vector.broadcast %148 : vector<1x256xf32> to vector<8x256xf32>
    %150 = arith.mulf %149, %147 : vector<8x256xf32>
    %151 = arith.addf %135, %150 : vector<8x256xf32>
    %c6_i32 = arith.constant 6 : i32
    %152 = tpu.dynamic_rotate %20 by %c6_i32 dim 0 : vector<8x256xf32>, i32 -> vector<8x256xf32>
    %c2_i32_63 = arith.constant 2 : i32
    %153 = vector.broadcast %c2_i32_63 : i32 to vector<8x256xi32>
    %154 = arith.addi %56, %153 : vector<8x256xi32>
    %c0_i32_64 = arith.constant 0 : i32
    %155 = vector.broadcast %c0_i32_64 : i32 to vector<8x256xi32>
    %156 = arith.cmpi sge, %154, %155 : vector<8x256xi32>
    %c2_i32_65 = arith.constant 2 : i32
    %157 = vector.broadcast %c2_i32_65 : i32 to vector<8x256xi32>
    %158 = arith.addi %56, %157 : vector<8x256xi32>
    %c8_i32_66 = arith.constant 8 : i32
    %159 = vector.broadcast %c8_i32_66 : i32 to vector<8x256xi32>
    %160 = arith.cmpi slt, %158, %159 : vector<8x256xi32>
    %161 = arith.andi %156, %160 : vector<8x256xi1>
    %cst_67 = arith.constant 0.000000e+00 : f32
    %162 = vector.broadcast %cst_67 : f32 to vector<8x256xf32>
    %163 = arith.select %161, %152, %162 : vector<8x256xi1>, vector<8x256xf32>
    %164 = vector.extract_strided_slice %98 {offsets = [4, 0], sizes = [1, 256], strides = [1, 1]} : vector<5x256xf32> to vector<1x256xf32>
    %165 = vector.broadcast %164 : vector<1x256xf32> to vector<8x256xf32>
    %166 = arith.mulf %165, %163 : vector<8x256xf32>
    %167 = arith.addf %151, %166 : vector<8x256xf32>
    %c0_68 = arith.constant 0 : index
    %c0_69 = arith.constant 0 : index
    %168 = vector.load %arg13[%c0_68, %c0_69] : memref<1x256xf32, #tpu.memory_space<vmem>>, vector<1x256xf32>
    %169 = vector.broadcast %168 : vector<1x256xf32> to vector<8x256xf32>
    %170 = arith.addf %167, %169 : vector<8x256xf32>
    %171 = tpu.concatenate %55, %20, %97, %170 in 1 : vector<8x256xf32>, vector<8x256xf32>, vector<8x256xf32>, vector<8x256xf32> -> vector<8x1024xf32>
    %c0_70 = arith.constant 0 : index
    %c0_71 = arith.constant 0 : index
    %172 = vector.load %arg14[%c0_70, %c0_71] : memref<1024x128xf32, #tpu.memory_space<vmem>>, vector<1024x128xf32>
    %cst_72 = arith.constant dense<0.000000e+00> : vector<8x128xf32>
    %173 = tpu.matmul %171, %172, %cst_72 {dimension_numbers = #tpu.dot_dimension_numbers<[1], [0], [0], [1], [0, 0, 1, 1], [], []>} : vector<8x1024xf32>, vector<1024x128xf32>, vector<8x128xf32> -> vector<8x128xf32>
    %c0_73 = arith.constant 0 : index
    %c0_74 = arith.constant 0 : index
    %174 = vector.load %arg15[%c0_73, %c0_74] : memref<1x128xf32, #tpu.memory_space<vmem>>, vector<1x128xf32>
    %175 = vector.broadcast %174 : vector<1x128xf32> to vector<8x128xf32>
    %176 = arith.addf %173, %175 : vector<8x128xf32>
    %177 = vector.shape_cast %176 : vector<8x128xf32> to vector<1x8x128xf32>
    %c0_75 = arith.constant 0 : index
    %c0_76 = arith.constant 0 : index
    %c0_77 = arith.constant 0 : index
    %178 = vector.load %arg16[%c0_75, %c0_76, %c0_77] : memref<1x8x128xf32, #tpu.memory_space<vmem>>, vector<1x8x128xf32>
    tpu.vector_store %arg16[%c0_75, %c0_76, %c0_77], %177 {strides = array<i32>} : memref<1x8x128xf32, #tpu.memory_space<vmem>>, vector<1x8x128xf32>,
    return
  }
  func.func @transform_0(%arg0: i32) -> (i32, i32, i32) {
    %c0_i32 = arith.constant 0 : i32
    %c0_i32_0 = arith.constant 0 : i32
    %c0_i32_1 = arith.constant 0 : i32
    return %arg0, %c0_i32, %c0_i32_0 : i32, i32, i32
  }
  func.func @transform_1(%arg0: i32) -> (i32, i32, i32) {
    %c0_i32 = arith.constant 0 : i32
    %c0_i32_0 = arith.constant 0 : i32
    %c0_i32_1 = arith.constant 0 : i32
    return %arg0, %c0_i32, %c0_i32_0 : i32, i32, i32
  }
  func.func @transform_2(%arg0: i32) -> (i32, i32, i32) {
    %c0_i32 = arith.constant 0 : i32
    %c0_i32_0 = arith.constant 0 : i32
    %c0_i32_1 = arith.constant 0 : i32
    return %arg0, %c0_i32, %c0_i32_0 : i32, i32, i32
  }
  func.func @transform_3(%arg0: i32) -> (i32, i32) {
    %c0_i32 = arith.constant 0 : i32
    %c0_i32_0 = arith.constant 0 : i32
    %c0_i32_1 = arith.constant 0 : i32
    return %c0_i32, %c0_i32_0 : i32, i32
  }
  func.func @transform_4(%arg0: i32) -> (i32, i32) {
    %c0_i32 = arith.constant 0 : i32
    %c0_i32_0 = arith.constant 0 : i32
    %c0_i32_1 = arith.constant 0 : i32
    return %c0_i32, %c0_i32_0 : i32, i32
  }
  func.func @transform_5(%arg0: i32) -> (i32, i32) {
    %c0_i32 = arith.constant 0 : i32
    %c0_i32_0 = arith.constant 0 : i32
    %c0_i32_1 = arith.constant 0 : i32
    return %c0_i32, %c0_i32_0 : i32, i32
  }
  func.func @transform_6(%arg0: i32) -> (i32, i32) {
    %c0_i32 = arith.constant 0 : i32
    %c0_i32_0 = arith.constant 0 : i32
    %c0_i32_1 = arith.constant 0 : i32
    return %c0_i32, %c0_i32_0 : i32, i32
  }
  func.func @transform_7(%arg0: i32) -> (i32, i32) {
    %c0_i32 = arith.constant 0 : i32
    %c0_i32_0 = arith.constant 0 : i32
    %c0_i32_1 = arith.constant 0 : i32
    return %c0_i32, %c0_i32_0 : i32, i32
  }
  func.func @transform_8(%arg0: i32) -> (i32, i32) {
    %c0_i32 = arith.constant 0 : i32
    %c0_i32_0 = arith.constant 0 : i32
    %c0_i32_1 = arith.constant 0 : i32
    return %c0_i32, %c0_i32_0 : i32, i32
  }
  func.func @transform_9(%arg0: i32) -> (i32, i32) {
    %c0_i32 = arith.constant 0 : i32
    %c0_i32_0 = arith.constant 0 : i32
    %c0_i32_1 = arith.constant 0 : i32
    return %c0_i32, %c0_i32_0 : i32, i32
  }
  func.func @transform_10(%arg0: i32) -> (i32, i32) {
    %c0_i32 = arith.constant 0 : i32
    %c0_i32_0 = arith.constant 0 : i32
    %c0_i32_1 = arith.constant 0 : i32
    return %c0_i32, %c0_i32_0 : i32, i32
  }
  func.func @transform_11(%arg0: i32) -> (i32, i32) {
    %c0_i32 = arith.constant 0 : i32
    %c0_i32_0 = arith.constant 0 : i32
    %c0_i32_1 = arith.constant 0 : i32
    return %c0_i32, %c0_i32_0 : i32, i32
  }
  func.func @transform_12(%arg0: i32) -> (i32, i32) {
    %c0_i32 = arith.constant 0 : i32
    %c0_i32_0 = arith.constant 0 : i32
    %c0_i32_1 = arith.constant 0 : i32
    return %c0_i32, %c0_i32_0 : i32, i32
  }
  func.func @transform_13(%arg0: i32) -> (i32, i32) {
    %c0_i32 = arith.constant 0 : i32
    %c0_i32_0 = arith.constant 0 : i32
    %c0_i32_1 = arith.constant 0 : i32
    return %c0_i32, %c0_i32_0 : i32, i32
  }
  func.func @transform_14(%arg0: i32) -> (i32, i32) {
    %c0_i32 = arith.constant 0 : i32
    %c0_i32_0 = arith.constant 0 : i32
    %c0_i32_1 = arith.constant 0 : i32
    return %c0_i32, %c0_i32_0 : i32, i32
  }
  func.func @transform_15(%arg0: i32) -> (i32, i32, i32) {
    %c0_i32 = arith.constant 0 : i32
    %c0_i32_0 = arith.constant 0 : i32
    %c0_i32_1 = arith.constant 0 : i32
    return %arg0, %c0_i32, %c0_i32_0 : i32, i32, i32
  }
}

</mosaic_0001>

<bundles_post_ra>
// kernel: tpu_custom_call.1
= control target key start
LH: loop header
LB: loop body
LE: loop exit
PB: predicated region body
PF: predicated region fallthrough
CT: control target
= control target key end

     0   :  { %s3412_s0 = inlined_call_operand.hbm [shape: f32[2,8,12], index: 0, kind: input, shape index: {}]   ;;  %s3413_s1 = inlined_call_operand.hbm [shape: f32[2,8,12], index: 1, kind: input, shape index: {}]   ;;  %s3414_s2 = inlined_call_operand.hbm [shape: f32[2,8,12], index: 2, kind: input, shape index: {}]   ;;  %s3415_s3 = inlined_call_operand.hbm [shape: f32[12,256], index: 3, kind: input, shape index: {}]   ;;  %s3416_s4 = inlined_call_operand.vmem [shape: f32[1,256], index: 4, kind: input, shape index: {}]   ;;  %s3417_s5 = inlined_call_operand.hbm [shape: f32[12,256], index: 5, kind: input, shape index: {}]   ;;  %s3418_s6 = inlined_call_operand.vmem [shape: f32[1,256], index: 6, kind: input, shape index: {}]   ;;  %s3419_s7 = inlined_call_operand.hbm [shape: f32[12,256], index: 7, kind: input, shape index: {}]   ;;  %s3420_s8 = inlined_call_operand.vmem [shape: f32[1,256], index: 8, kind: input, shape index: {}]   ;;  %s3421_s9 = inlined_call_operand.vmem [shape: f32[3,256], index: 9, kind: input, shape index: {}]   ;;  %s3422_s10 = inlined_call_operand.vmem [shape: f32[1,256], index: 10, kind: input, shape index: {}]   ;;  %s3423_s11 = inlined_call_operand.vmem [shape: f32[5,256], index: 11, kind: input, shape index: {}]   ;;  %s3424_s12 = inlined_call_operand.vmem [shape: f32[1,256], index: 12, kind: input, shape index: {}]   ;;  %s3425_s13 = inlined_call_operand.hbm [shape: f32[1024,128], index: 13, kind: input, shape index: {}]   ;;  %s3426_s14 = inlined_call_operand.vmem [shape: f32[1,128], index: 14, kind: input, shape index: {}]   ;;  %s3427_s15 = inlined_call_operand.hbm [shape: f32[2,8,128], index: 15, kind: output, shape index: {}]  }
   0x1   :  { %3452 = sst [smem:[#allocation26_spill]] %s3413_s1 }
   0x2   :  { %3453 = sst [smem:[#allocation27_spill]] %s3415_s3 }
   0x3   :  { %3454 = sst [smem:[#allocation28_spill]] %s3416_s4 }
   0x4   :  { %3455 = sst [smem:[#allocation29_spill]] %s3419_s7 }
   0x5   :  { %3456 = sst [smem:[#allocation30_spill]] %s3420_s8 }
   0x6   :  { %3457 = sst [smem:[#allocation31_spill]] %s3421_s9 }
   0x7   :  { %3458 = sst [smem:[#allocation32_spill]] %s3422_s10 }
   0x8   :  { %3459 = sst [smem:[#allocation33_spill]] %s3423_s11 }
   0x9   :  { %3460 = sst [smem:[#allocation34_spill]] %s3424_s12 }
   0xa   :  { %3461 = sst [smem:[#allocation35_spill]] %s3426_s14 }
   0xb   :  { %3462 = sst [smem:[#allocation36_spill]] %s3427_s15 }
   0xc   :  { %20 = vsyncpa [#allocation3], 0 }
   0xd   :  { %22 = vsyncpa [#allocation3 + $0x1], 0 }
   0xe   :  { %23 = vsyncpa [#allocation6], 0 }
   0xf   :  { %25 = vsyncpa [#allocation6 + $0x1], 0 }
  0x10   :  { %26 = vsyncpa [#allocation9], 0 }
  0x11   :  { %27 = vsyncpa [#allocation12], 0 }
  0x12   :  { %28 = vsyncpa [#allocation4], 0 }
  0x13   :  { %30 = vsyncpa [#allocation4 + $0x1], 0  ;;  %s2857_s18 = smov 0   ;;  %s2859_s19 = smov 0  }
  0x14   :  { %s2861_s20 = smov 0   ;;  %s2863_s21 = smov 0  }
  0x15 LB: > { %3463 = sst [smem:[#allocation20_spill]] %s2748_s18  ;;  %s2762_s22 = smov [#allocation8]   ;;  %s2760_s21 = sphi %s2863_s21, %s3511_s21   ;;  %s2756_s20 = sphi %s2861_s20, %s3515_s20   ;;  %s2752_s19 = sphi %s2859_s19, %s3514_s19   ;;  %s2748_s18 = sphi %s2857_s18, %s3513_s18  }
  0x16   : > { %3464 = sst [smem:[#allocation21_spill]] %s2760_s21  ;;  %s409_s23 = sshll.u32 %s2762_s22, 4  ;;  %s2883_s23 = int_to_ptr.vmem [resolvable:$true] %s409_s23 }
  0x17   : > { %s2878_s24 = sadd.s32 4294967295, %s2760_s21   ;;  %p2017_p0 = scmp.ge.s32.totalorder %s2760_s21, 1 }
  0x18   : > { %p3439_p1 = scmp.eq.s32.totalorder %s2878_s24, 0  ;;  %p397_p2 = scmp.lt.s32.totalorder %s2760_s21, 3 }
  0x19   : > { %s2763_s26 = smov [#allocation11]   ;;  %s3467_s3 = sld [smem:[#allocation27_spill]] }
  0x1a   : > { %p2885_p3 = pnand %p2017_p0, %p397_p2  ;;  %s441_s27 = sshll.u32 %s2763_s26, 4  ;;  %s2898_s27 = int_to_ptr.vmem [resolvable:$true] %s441_s27 }
  0x1c   : > { %s3465_s25 = scalar_select %p2885_p3, 1, 0 }
  0x1d   : > { %p2392_p5 = pneg %p2885_p3 }
  0x1f   : > { %p2894_p6 = pnand %p2392_p5, %p3439_p1  ;;  %s2480_s16 = scalar_lea.hbm %s3467_s3, 512 }
  0x20   : > { %p2481_p7 = scmp.ne.s32.totalorder %s3467_s3, %s2480_s16  ;;  %p2487_p11 = scmp.lt.u32.totalorder %s2480_s16, %s3467_s3 }
  0x21   : > { %s3466_s28 = scalar_select %p2894_p6, 1, 0 }
  0x22   : > { %p2908_p8 = pneg %p2894_p6 }
  0x24   : > { %s3468_s15 = scalar_select %p2908_p8, 1, 0 }
  0x25   : > { %p2483_p9 = pnand %p2908_p8, %p2481_p7 }
  0x27   : > { %p2484_p10 = pneg %p2483_p9 }
  0x29   : > { %p2489_p12 = pnand %p2487_p11, %p2484_p10 }
  0x2b   : > { %2492 = shalt.err (!%p2489_p12)
}
  0x2c   : > { %s2493_s29 = scalar_lea.vmem %s2883_s23, 512  ;;  %p2501_p5 = scmp.lt.s32.totalorder %s2883_s23, %s2883_s23 }
  0x2d   : > { %p2494_p13 = scmp.ne.s32.totalorder %s2883_s23, %s2493_s29  ;;  %p2502_p4 = scmp.lt.s32.totalorder %s2493_s29, %s2493_s29 }
  0x2f   : > { %p2496_p0 = pnand %p2494_p13, %p2908_p8  ;;  %p2503_p7 = por %p2502_p4, %p2501_p5 }
  0x31   : > { %p2497_p2 = pneg %p2496_p0 }
  0x33   : > { %p2504_p9 = pnand %p2503_p7, %p2497_p2 }
  0x35   : > { %2507 = shalt.err (!%p2504_p9)
}
  0x36   : > { %s3431_s30 = smov 256   ;;  %s3432_s14 = smov 16  }
  0x37   : > { %2395 = dma.hbm_to_vmem [thread:$0]  (!%p2894_p6), %s3467_s3, 512, %s2883_s23, [#allocation9], %s3431_s30, %s3431_s30, %s3432_s14  }
  0x38   : > { %s3469_s7 = sld [smem:[#allocation29_spill]] }
  0x3e   : > { %s2508_s29 = scalar_lea.hbm %s3469_s7, 512 }
  0x3f   : > { %p2509_p4 = scmp.ne.s32.totalorder %s3469_s7, %s2508_s29  ;;  %p2515_p12 = scmp.lt.u32.totalorder %s2508_s29, %s3469_s7 }
  0x41   : > { %p2511_p10 = pnand %p2509_p4, %p2908_p8 }
  0x43   : > { %p2512_p11 = pneg %p2511_p10 }
  0x45   : > { %p2517_p13 = pnand %p2515_p12, %p2512_p11 }
  0x47   : > { %2520 = shalt.err (!%p2517_p13)
}
  0x48   : > { %s2521_s23 = scalar_lea.vmem %s2898_s27, 512  ;;  %p2529_p7 = scmp.lt.s32.totalorder %s2898_s27, %s2898_s27 }
  0x49   : > { %p2522_p0 = scmp.ne.s32.totalorder %s2898_s27, %s2521_s23  ;;  %p2530_p9 = scmp.lt.s32.totalorder %s2521_s23, %s2521_s23 }
  0x4b   : > { %p2524_p2 = pnand %p2522_p0, %p2908_p8  ;;  %p2531_p4 = por %p2530_p9, %p2529_p7 }
  0x4d   : > { %p2525_p5 = pneg %p2524_p2 }
  0x4f   : > { %p2532_p10 = pnand %p2531_p4, %p2525_p5 }
  0x51   : > { %2535 = shalt.err (!%p2532_p10)
}
  0x52   : > { %2401 = dma.hbm_to_vmem [thread:$0]  (!%p2894_p6), %s3469_s7, 512, %s2898_s27, [#allocation12], %s3431_s30, %s3431_s30, %s3432_s14  }
  0x53   : > { %s2016_s11 = sadd.s32 4294967294, %s2760_s21   ;;  %s2960_s12 = sadd.s32 1, %s2760_s21  }
  0x54   : > { %3470 = sst [smem:[#allocation22_spill]] %s2960_s12  ;;  %s40_s16 = ssub.s32 %s2760_s21, %s2960_s12 }
  0x55   : > { %s43_s17 = sadd.s32 1, %s2756_s20  ;;  %p41_p11 = scmp.eq.s32.totalorder %s40_s16, 0 }
  0x56   : > { %p50_p12 = scmp.ne.s32.totalorder %s2756_s20, %s2752_s19  ;;  %p51_p13 = scmp.eq.s32.totalorder %s2760_s21, 0 }
  0x57   : > { %p56_p0 = scmp.ne.s32.totalorder %s2752_s19, %s2748_s18  ;;  %p384_p7 = scmp.eq.s32.totalorder %s2878_s24, 1 }
  0x58   : > { %s2971_s22 = scalar_select %p41_p11, %s2756_s20, %s43_s17  }
  0x59   : > { %p52_p2 = por %p51_p13, %p50_p12  ;;  %p2975_p5 = por %p3439_p1, %p56_p0 }
  0x5a   : > { %3471 = sst [smem:[#allocation23_spill]] %s2971_s22  ;;  %p390_p9 = scmp.eq.s32.totalorder %s2016_s11, 1 }
  0x5b   : > { %s3472_s26 = scalar_select %p2975_p5, 1, 0 }
  0x5c   : > { %p2423_p4 = scmp.lt.s32.totalorder %s2760_s21, 2  ;;  %s3433_s27 = sand.u32 1, %s2756_s20  }
  0x5d   : > { %p2982_p10 = por %p384_p7, %p50_p12  ;;  %p2986_p3 = por %p390_p9, %p56_p0 }
  0x5e   : > { %s2992_s9 = sshll.u32 %s3433_s27, 3  ;;  %s2995_s10 = sshll.u32 %s2760_s21, 7 }
  0x5f   : > { %s3473_s29 = scalar_select %p2982_p10, 1, 0 }
  0x60   : > { %s3475_s23 = scalar_select %p2986_p3, 1, 0 }
  0x61   : > { %3474 = sst [smem:[#allocation24_spill]] %s3473_s29  ;;  %p2997_p11 = pnand %p2423_p4, %p52_p2 }
  0x62   : > { %3476 = sst [smem:[#allocation25_spill]] %s3475_s23  ;;  %s504_s11 = sand.u32 1, %s2760_s21  }
  0x63   : > { %s3477_s16 = scalar_select %p2997_p11, 1, 0 }
  0x64   : > { %s3478_s1 = sld [smem:[#allocation26_spill]]  ;;  %s508_s27 = scalar_lea.vmem [#allocation5], %s2992_s9 }
  0x65   : > { %s515_s3 = sshll.u32 %s508_s27, 4  ;;  %s2766_s7 = smov [#allocation10]   ;;  %s3009_s3 = int_to_ptr.vmem [resolvable:$true] %s515_s3 }
  0x66   : > { %s3011_s22 = sshll.u32 %s2766_s7, 4  ;;  %s3013_s12 = scalar_lea.sflag [#allocation6], %s504_s11  ;;  %s426_s22 = int_to_ptr.vmem [resolvable:$true] %s3011_s22 }
  0x67   : > { %p3019_p13 = pneg %p2997_p11 }
  0x69   : > { %s3479_s30 = scalar_select %p3019_p13, 1, 0 }
  0x6a   : > { %s3006_s14 = scalar_lea.hbm %s3478_s1, %s2995_s10  ;;  %s2541_s21 = scalar_lea.hbm %s3478_s1, 256 }
  0x6b   : > { %s2536_s23 = scalar_lea.hbm %s3006_s14, 128  ;;  %p2542_p7 = scmp.lt.u32.totalorder %s3006_s14, %s3478_s1 }
  0x6c   : > { %p2537_p12 = scmp.ne.s32.totalorder %s3006_s14, %s2536_s23  ;;  %p2543_p9 = scmp.lt.u32.totalorder %s2541_s21, %s2536_s23 }
  0x6d   : > { %p2545_p1 = scmp.lt.u32.totalorder %s2536_s23, %s3006_s14 }
  0x6e   : > { %p2539_p0 = pnand %p3019_p13, %p2537_p12  ;;  %p2544_p4 = por %p2543_p9, %p2542_p7 }
  0x70   : > { %p2540_p2 = pneg %p2539_p0  ;;  %p2546_p3 = por %p2545_p1, %p2544_p4 }
  0x72   : > { %p2547_p10 = pnand %p2546_p3, %p2540_p2 }
  0x74   : > { %2550 = shalt.err (!%p2547_p10)
}
  0x75   : > { %s2551_s11 = scalar_lea.vmem %s3009_s3, 128  ;;  %s2767_s17 = smov [#allocation5]  }
  0x76   : > { %p2552_p12 = scmp.ne.s32.totalorder %s3009_s3, %s2551_s11  ;;  %s2556_s27 = sshll.u32 %s2767_s17, 4  ;;  %s2557_s27 = int_to_ptr.vmem [resolvable:$false] %s2556_s27 }
  0x77   : > { %s2558_s18 = scalar_lea.vmem %s2557_s27, 256  ;;  %p2559_p6 = scmp.lt.s32.totalorder %s3009_s3, %s2557_s27 }
  0x78   : > { %p2554_p0 = pnand %p2552_p12, %p3019_p13  ;;  %p2560_p8 = scmp.lt.s32.totalorder %s2558_s18, %s2551_s11 }
  0x7a   : > { %p2555_p5 = pneg %p2554_p0  ;;  %p2561_p7 = por %p2560_p8, %p2559_p6 }
  0x7c   : > { %p2562_p9 = pnand %p2561_p7, %p2555_p5 }
  0x7e   : > { %2565 = shalt.err (!%p2562_p9)
}
  0x7f   : > { %2411 = dma.hbm_to_vmem [thread:$0]  (!%p2997_p11), %s3006_s14, 128, %s3009_s3, %s3013_s12  }
  0x80   : > { %s2566_s7 = scalar_lea.hbm %s3417_s5, 512  ;;  %p3480_p3 = scmp.ne.s32.totalorder %s3468_s15, 0 }
  0x81   : > { %p2567_p1 = scmp.ne.s32.totalorder %s3417_s5, %s2566_s7  ;;  %p2573_p5 = scmp.lt.u32.totalorder %s2566_s7, %s3417_s5 }
  0x83   : > { %p2569_p6 = pnand %p2567_p1, %p3480_p3 }
  0x85   : > { %p2570_p8 = pneg %p2569_p6 }
  0x87   : > { %p2575_p10 = pnand %p2573_p5, %p2570_p8 }
  0x89   : > { %2578 = shalt.err (!%p2575_p10)
}
  0x8a   : > { %s2579_s18 = scalar_lea.vmem %s426_s22, 512  ;;  %p2587_p0 = scmp.lt.s32.totalorder %s426_s22, %s426_s22 }
  0x8b   : > { %p2580_p2 = scmp.ne.s32.totalorder %s426_s22, %s2579_s18  ;;  %p2588_p7 = scmp.lt.s32.totalorder %s2579_s18, %s2579_s18 }
  0x8d   : > { %p2582_p4 = pnand %p2580_p2, %p3480_p3  ;;  %p2589_p9 = por %p2588_p7, %p2587_p0 }
  0x8f   : > { %p2583_p12 = pneg %p2582_p4 }
  0x91   : > { %p2590_p11 = pnand %p2589_p9, %p2583_p12 }
  0x93   : > { %2593 = shalt.err (!%p2590_p11)
}
  0x94   : > { %p3481_p1 = scmp.ne.s32.totalorder %s3466_s28, 0  ;;  %s3482_s1 = smov 16  }
  0x95   : > { %s3483_s3 = smov 256   ;;  %s2768_s23 = smov [#allocation13]  }
  0x96   : > { %2398 = dma.hbm_to_vmem [thread:$0]  (!%p3481_p1), %s3417_s5, 512, %s426_s22, [#allocation9], %s3483_s3, %s3483_s3, %s3482_s1  }
  0x97   : > { %s469_s7 = sshll.u32 %s2768_s23, 4  ;;  %s2594_s27 = scalar_lea.hbm %s3425_s13, 16384  ;;  %s470_s7 = int_to_ptr.vmem [resolvable:$true] %s469_s7 }
  0x98   : > { %p2595_p11 = scmp.ne.s32.totalorder %s3425_s13, %s2594_s27  ;;  %p2601_p5 = scmp.lt.u32.totalorder %s2594_s27, %s3425_s13 }
  0x9a   : > { %p2597_p6 = pnand %p2595_p11, %p3480_p3 }
  0x9c   : > { %p2598_p8 = pneg %p2597_p6 }
  0x9e   : > { %p2603_p10 = pnand %p2601_p5, %p2598_p8 }
  0xa0   : > { %2606 = shalt.err (!%p2603_p10)
}
  0xa1   : > { %s2607_s22 = scalar_lea.vmem %s470_s7, 16384  ;;  %p2615_p0 = scmp.lt.s32.totalorder %s470_s7, %s470_s7 }
  0xa2   : > { %p2608_p2 = scmp.ne.s32.totalorder %s470_s7, %s2607_s22  ;;  %p2616_p7 = scmp.lt.s32.totalorder %s2607_s22, %s2607_s22 }
  0xa4   : > { %p2610_p4 = pnand %p2608_p2, %p3480_p3  ;;  %p2617_p9 = por %p2616_p7, %p2615_p0 }
  0xa6   : > { %p2611_p12 = pneg %p2610_p4 }
  0xa8   : > { %p2618_p13 = pnand %p2617_p9, %p2611_p12 }
  0xaa   : > { %2621 = shalt.err (!%p2618_p13)
}
  0xab   : > { %s2769_s29 = smov 128   ;;  %s2770_s4 = smov 8  }
  0xac   : > { %2404 = dma.hbm_to_vmem [thread:$0]  (!%p3481_p1), %s3425_s13, 16384, %s470_s7, [#allocation12], %s2769_s29, %s2769_s29, %s2770_s4  }
  0xad   : > { %s3087_s14 = scalar_lea.hbm %s3412_s0, %s2995_s10  ;;  %s490_s21 = scalar_lea.vmem [#allocation2], %s2992_s9 }
  0xae   : > { %s497_s23 = sshll.u32 %s490_s21, 4  ;;  %s3484_s17 = sand.u32 1, %s2756_s20   ;;  %s498_s23 = int_to_ptr.vmem [resolvable:$true] %s497_s23 }
  0xaf   : > { %s487_s11 = scalar_lea.sflag [#allocation3], %s3484_s17  ;;  %s2622_s27 = scalar_lea.hbm %s3087_s14, 128 }
  0xb0   : > { %p2623_p13 = scmp.ne.s32.totalorder %s3087_s14, %s2622_s27  ;;  %p3485_p3 = scmp.ne.s32.totalorder %s3479_s30, 0 }
  0xb1   : > { %s2627_s18 = scalar_lea.hbm %s3412_s0, 256  ;;  %p2628_p1 = scmp.lt.u32.totalorder %s3087_s14, %s3412_s0 }
  0xb2   : > { %p2625_p11 = pnand %p2623_p13, %p3485_p3  ;;  %p2629_p8 = scmp.lt.u32.totalorder %s2627_s18, %s2622_s27 }
  0xb3   : > { %p2631_p10 = scmp.lt.u32.totalorder %s2622_s27, %s3087_s14 }
  0xb4   : > { %p2626_p6 = pneg %p2625_p11  ;;  %p2630_p5 = por %p2629_p8, %p2628_p1 }
  0xb6   : > { %p2632_p2 = por %p2631_p10, %p2630_p5 }
  0xb8   : > { %p2633_p4 = pnand %p2632_p2, %p2626_p6 }
  0xba   : > { %2636 = shalt.err (!%p2633_p4)
}
  0xbb   : > { %s2637_s4 = scalar_lea.vmem %s498_s23, 128  ;;  %s2771_s8 = smov [#allocation2]  }
  0xbc   : > { %p2638_p12 = scmp.ne.s32.totalorder %s498_s23, %s2637_s4  ;;  %s2642_s1 = sshll.u32 %s2771_s8, 4  ;;  %s2643_s1 = int_to_ptr.vmem [resolvable:$false] %s2642_s1 }
  0xbd   : > { %s2644_s15 = scalar_lea.vmem %s2643_s1, 256  ;;  %p2645_p9 = scmp.lt.s32.totalorder %s498_s23, %s2643_s1 }
  0xbe   : > { %p2640_p0 = pnand %p2638_p12, %p3485_p3  ;;  %p2646_p13 = scmp.lt.s32.totalorder %s2644_s15, %s2637_s4 }
  0xc0   : > { %p2641_p7 = pneg %p2640_p0  ;;  %p2647_p11 = por %p2646_p13, %p2645_p9 }
  0xc2   : > { %p2648_p1 = pnand %p2647_p11, %p2641_p7 }
  0xc4   : > { %2651 = shalt.err (!%p2648_p1)
}
  0xc5   : > { %p3486_p8 = scmp.ne.s32.totalorder %s3477_s16, 0  ;;  %s3113_s17 = scalar_lea.hbm %s3414_s2, %s2995_s10 }
  0xc6   : > { %s526_s27 = scalar_lea.vmem [#allocation7], %s2992_s9  ;;  %s2652_s7 = scalar_lea.hbm %s3113_s17, 128 }
  0xc7   : > { %2408 = dma.hbm_to_vmem [thread:$0]  (!%p3486_p8), %s3087_s14, 128, %s498_s23, %s487_s11  }
  0xc8   : > { %s533_s28 = sshll.u32 %s526_s27, 4  ;;  %p2653_p6 = scmp.ne.s32.totalorder %s3113_s17, %s2652_s7  ;;  %s534_s28 = int_to_ptr.vmem [resolvable:$true] %s533_s28 }
  0xc9   : > { %s2657_s14 = scalar_lea.hbm %s3414_s2, 256  ;;  %p2658_p2 = scmp.lt.u32.totalorder %s3113_s17, %s3414_s2 }
  0xca   : > { %p2655_p5 = pnand %p2653_p6, %p3485_p3  ;;  %p2659_p4 = scmp.lt.u32.totalorder %s2657_s14, %s2652_s7 }
  0xcb   : > { %p2661_p0 = scmp.lt.u32.totalorder %s2652_s7, %s3113_s17 }
  0xcc   : > { %p2656_p10 = pneg %p2655_p5  ;;  %p2660_p12 = por %p2659_p4, %p2658_p2 }
  0xce   : > { %p2662_p7 = por %p2661_p0, %p2660_p12 }
  0xd0   : > { %p2663_p9 = pnand %p2662_p7, %p2656_p10 }
  0xd2   : > { %2666 = shalt.err (!%p2663_p9)
}
  0xd3   : > { %s2667_s9 = scalar_lea.vmem %s534_s28, 128  ;;  %s2772_s10 = smov [#allocation7]  }
  0xd4   : > { %p2668_p13 = scmp.ne.s32.totalorder %s534_s28, %s2667_s9  ;;  %s2672_s29 = sshll.u32 %s2772_s10, 4  ;;  %s2673_s29 = int_to_ptr.vmem [resolvable:$false] %s2672_s29 }
  0xd5   : > { %s2674_s4 = scalar_lea.vmem %s2673_s29, 256  ;;  %p2675_p6 = scmp.lt.s32.totalorder %s534_s28, %s2673_s29 }
  0xd6   : > { %p2670_p11 = pnand %p2668_p13, %p3485_p3  ;;  %p2676_p5 = scmp.lt.s32.totalorder %s2674_s4, %s2667_s9 }
  0xd8   : > { %p2671_p1 = pneg %p2670_p11  ;;  %p2677_p8 = por %p2676_p5, %p2675_p6 }
  0xda   : > { %p2678_p2 = pnand %p2677_p8, %p2671_p1 }
  0xdc   : > { %2681 = shalt.err (!%p2678_p2)
}
  0xdd   : > { %p3487_p4 = scmp.ne.s32.totalorder %s3477_s16, 0  ;;  %p3488_p10 = scmp.ne.s32.totalorder %s3465_s25, 0 }
  0xde   : > { %s3137_s30 = sand.u32 (!%p3488_p10), 1, %s2752_s19   ;;  %p3489_p3 = scmp.ne.s32.totalorder (!%p3488_p10), %s3472_s26, 0 }
  0xdf   : > { %2414 = dma.hbm_to_vmem [thread:$0]  (!%p3487_p4), %s3113_s17, 128, %s534_s28, %s3013_s12  }
  0xe0   : > { %542 = sbr.rel (%p3488_p10) target bundleno = 1475 (0x5c3), region = 80  ;;  %s3140_s8 = sshll.u32 (!%p3488_p10), %s3137_s30, 3 }
  0xe1   : > { %s545_s1 = scalar_lea.sflag (!%p3488_p10), [#allocation3], %s3137_s30  ;;  %s548_s15 = scalar_lea.vmem (!%p3488_p10), [#allocation2], %s3140_s8 }
  0xe7   : > { %2727 = dma.done.wait (%p3489_p3), %s545_s1, 128  }
  0xe8   : > { %2729 = vsyncadd (%p3489_p3), %s545_s1, 4294967168  ;;  %s553_s25 = sand.u32 1, %s2878_s24   ;;  %s557_s16 = scalar_lea.vmem [#allocation5], %s3140_s8 }
  0xe9   : > { %s554_s12 = scalar_lea.sflag [#allocation6], %s553_s25 }
  0xea   : > { %2731 = dma.done.wait (%p3489_p3), %s554_s12, 256  }
  0xeb   : > { %2733 = vsyncadd (%p3489_p3), %s554_s12, 4294967040  ;;  %s566_s3 = scalar_lea.vmem [#allocation7], %s3140_s8  ;;  %p3490_p8 = scmp.eq.s32.totalorder %s2878_s24, 0 }
  0xed   : > { %2735 = dma.done.wait (%p3490_p8), [#allocation9], 1024   ;;  %p3491_p12 = pmov %p3490_p8 }
  0xee   : > { %p3492_p0 = pmov %p3490_p8 }
  0xef   : > { %2737 = vsyncadd (%p3491_p12), [#allocation9], 4294966272 }
  0xf0   : > { %2739 = dma.done.wait (%p3492_p0), [#allocation12], 16896   ;;  %p3493_p7 = pmov %p3492_p0 }
  0xf1   : > { %v2773_v0 = vmov 0.0   ;;  %vm662_vm0 = vcmask 1043456   ;;  %vm2774_vm1 = vmmov 1   ;;  %v741_v2 = vld [vmem:[#allocation10 + $0x8] sm:$0xff]  ;;  %v743_v3 = vld [vmem:[#allocation10 + $0x18] sm:$0xf]  ;;  %v648_v16 = vlaneseq }
  0xf2   : > { %2741 = vsyncadd (%p3493_p7), [#allocation12], 4294950400  ;;  %829 = vmatprep.mubr.f32.mxu1 %v2773_v0  ;;  %733 = vmatprep.mubr.f32.mxu0 %v2773_v0  ;;  %v740_v4 = vld [vmem:[#allocation10] sm:$0xff]  ;;  %v2228_v5 = vpack.c.bf16 %v743_v3, %v741_v2  ;;  %v742_v6 = vld [vmem:[#allocation10 + $0x10] sm:$0xf]  ;;  %vm658_vm3 = vcmask 97280  }
  0xf3   : > { %vm3165_vm2 = vmpackc.low %vm662_vm0, %vm2774_vm1  ;;  %v643_v7 = vld [vmem:[#allocation8 + $0x8] sm:$0xff]  ;;  %v645_v8 = vld [vmem:[#allocation8 + $0x18] sm:$0xf]  ;;  %v2231_v9 = vpack.c.bf16 %v742_v6, %v740_v4  ;;  %vm2775_vm4 = vmmov 0   ;;  %v3185_v17 = vshrl.u32 %v648_v16, 7  ;;  %s3496_s28 = sld [smem:[#allocation28_spill]] }
  0xf4   : > { %v2222_v10 = vpack.c.bf16 %v645_v8, %v643_v7  ;;  %v642_v11 = vld [vmem:[#allocation8] sm:$0xff]  ;;  %v644_v12 = vld [vmem:[#allocation8 + $0x10] sm:$0xf]  ;;  %2230 = vmatprep.subr.msk.bf16.mxu1 %vm3165_vm2, %v2228_v5  ;;  %v837_v34 = vld [vmem:[#allocation11 + $0x8] sm:$0xff]  ;;  %vm1003_vm5 = vcmask 64512   ;;  %s3497_s22 = sld [smem:[#allocation30_spill]] }
  0xf5   : > { %v2225_v13 = vpack.c.bf16 %v644_v12, %v642_v11  ;;  %2233 = vmatpush1.bf16.msk.msra.mxu1 %vm3165_vm2, %v2231_v9  ;;  %v640_v14 = vld [vmem:[%s557_s16] sm:$0xff]  ;;  %v639_v15 = vld [vmem:[%s548_s15] sm:$0xff]  ;;  %v3188_v18 = vsub.s32 0, %v3185_v17  ;;  %v3198_v22 = vsub.s32 1, %v3185_v17  ;;  %v1248_v3 = vadd.s32 4294967295, %v3185_v17  ;;  %s3498_s11 = sld [smem:[#allocation31_spill]] }
  0xf6   : > { %2224 = vmatprep.subr.msk.bf16.mxu0 %vm3165_vm2, %v2222_v10  ;;  %2202 = vmatprep.subr.mxu1 %v2773_v0  ;;  %v744_v19 = vld [vmem:[%s3418_s6] sm:$0x3]  ;;  %v839_v35 = vld [vmem:[#allocation11 + $0x18] sm:$0xf]  ;;  %v836_v36 = vld [vmem:[#allocation11] sm:$0xff]  ;;  %v3239_v4 = vsub.s32 4, %v3185_v17 }
  0xf7   : > { %2227 = vmatpush1.bf16.msk.msra.mxu0 %vm3165_vm2, %v2225_v13  ;;  %v749_v21 = vrot.slane %v744_v19, %v3188_v18  ;;  %v753_v26 = vrot.slane %v744_v19, %v3198_v22  ;;  %v2234_v37 = vpack.c.bf16 %v839_v35, %v837_v34  ;;  %v838_v38 = vld [vmem:[#allocation11 + $0x10] sm:$0xf]  ;;  %v1301_v5 = vadd.s32 1, %v3185_v17  ;;  %s3499_s29 = sld [smem:[#allocation33_spill]]  ;;  %s3500_s15 = sld [smem:[#allocation34_spill]] }
  0xf8   : > { %2043 = vmatmul.mubr.msk.f32.vlgmr.msra.gmra.mrb[0].mxu1 %vm658_vm3, %v640_v14  ;;  %v2237_v39 = vpack.c.bf16 %v838_v38, %v836_v36  ;;  %v641_v40 = vld [vmem:[%s566_s3] sm:$0xff]  ;;  %vm1249_vm6 = vcmp.ge.s32.totalorder %v1248_v3, 0  ;;  %v3249_v10 = vsub.s32 2, %v3185_v17  ;;  %v1283_v11 = vsub.s32 5, %v3185_v17  ;;  %s3501_s26 = sld [smem:[#allocation32_spill]]  ;;  %s3502_s27 = sld [smem:[#allocation35_spill]] }
  0xf9   : > { %2204 = vmatprep.mubr.msk.f32.mxu1 %vm2775_vm4, %v2773_v0  ;;  %v646_v20 = vld [vmem:[%s3496_s28] sm:$0x3]  ;;  %2236 = vmatprep.subr.msk.bf16.mxu0 %vm3165_vm2, %v2234_v37  ;;  %vm1303_vm7 = vcmp.lt.s32.totalorder %v1301_v5, 8  ;;  %v1313_v12 = vsub.s32 6, %v3185_v17  ;;  %s3503_s28 = sld [smem:[#allocation24_spill]]  ;;  %s2051_s7 = sshll.u32 %s2878_s24, 7 }
  0xfa   : > { %2040 = vmatmul.mubr.msk.f32.vlgmr.msra.gmra.mrb[0].mxu0 %vm658_vm3, %v639_v15  ;;  %v651_v23 = vrot.slane %v646_v20, %v3188_v18  ;;  %v655_v31 = vrot.slane %v646_v20, %v3198_v22  ;;  %v840_v59 = vld [vmem:[%s3497_s22] sm:$0x3]  ;;  %s638_s18 = scalar_lea.vmem [#allocation14], %s3140_s8  ;;  %s1852_s10 = scalar_lea.sflag [#allocation4], %s3137_s30 }
  0xfb   : > { %925 = vmatprep.mubr.f32.mxu0 %v2773_v0  ;;  %2239 = vmatpush1.bf16.msk.msra.mxu0 %vm3165_vm2, %v2237_v39  ;;  %v845_v60 = vrot.slane %v840_v59, %v3188_v18  ;;  %v849_v62 = vrot.slane %v840_v59, %v3198_v22  ;;  %v1245_v6 = vld [vmem:[%s3498_s11] sm:$0x77]  ;;  %s1865_s22 = sshll.u32 %s638_s18, 4  ;;  %s3504_s11 = sld [smem:[#allocation36_spill]]  ;;  %s3370_s22 = int_to_ptr.vmem [resolvable:$true] %s1865_s22 }
  0xfc   : > { %2207 = vmatprep.subr.mxu0 %v2773_v0  ;;  %v1262_v9 = vrot.slane %v1245_v6, %v3239_v4  ;;  %v1284_v19 = vrot.slane %v1245_v6, %v1283_v11  ;;  %v1314_v20 = vrot.slane %v1245_v6, %v1313_v12  ;;  %s2682_s4 = scalar_lea.vmem %s3370_s22, 128  ;;  %s2776_s24 = smov [#allocation14]  }
  0xfd   : > { %p2683_p9 = scmp.ne.s32.totalorder %s3370_s22, %s2682_s4  ;;  %s2686_s8 = sshll.u32 %s2776_s24, 4  ;;  %s2687_s8 = int_to_ptr.vmem [resolvable:$false] %s2686_s8 }
  0xfe   : > { %2046 = vmatmul.mubr.msk.f32.vlgmr.msra.gmra.mrb[2].mxu0 %vm658_vm3, %v641_v40  ;;  %v1272_v15 = vrot.slane %v1262_v9, %v3188_v18  ;;  %v1460_v9 = vld [vmem:[#allocation13 + $0xc8] sm:$0xff]  ;;  %s2688_s1 = scalar_lea.vmem %s2687_s8, 256  ;;  %p2689_p6 = scmp.lt.s32.totalorder %s3370_s22, %s2687_s8 }
  0xff   : > { %2209 = vmatprep.mubr.msk.f32.mxu0 %vm2775_vm4, %v2773_v0  ;;  %p3505_p13 = scmp.ne.s32.totalorder %s3503_s28, 0  ;;  %p2690_p5 = scmp.lt.s32.totalorder %s2688_s1, %s2682_s4 }
 0x101   : > { %s3368_s9 = scalar_lea.hbm %s3504_s11, %s2051_s7  ;;  %p2684_p11 = pnand %p2683_p9, %p3505_p13 }
 0x102   : > { %p2691_p2 = por %p2690_p5, %p2689_p6 }
 0x103   : > { %p2685_p1 = pneg %p2684_p11 }
 0x105   : > { %p2692_p4 = pnand %p2691_p2, %p2685_p1 }
 0x1cb   : > { %v831_v24 = vpop.f32.mrb[0].mxu1 }
 0x1cc   : > { %v832_v25 = vadd.f32 %v831_v24, %v749_v21  ;;  %v833_v27 = vpop.f32.mrb[1].mxu1  ;;  %v1258_v21 = vrot.slane %v1245_v6, %v3188_v18 }
 0x1cd   : > { %v735_v28 = vpop.f32.mrb[0].mxu0  ;;  %v834_v32 = vadd.f32 %v833_v27, %v753_v26  ;;  %v1294_v26 = vrot.slane %v1284_v19, %v3198_v22  ;;  %v1324_v27 = vrot.slane %v1314_v20, %v3249_v10  ;;  %v1462_v19 = vld [vmem:[#allocation13 + $0xd8] sm:$0xff] }
 0x1ce   : > { %v736_v29 = vadd.f32 %v735_v28, %v651_v23  ;;  %v737_v30 = vpop.f32.mrb[1].mxu0  ;;  %2203 = vmatpush3.xpose.msra.mxu1 %v832_v25  ;;  %v1280_v25 = vrot.slane %v1245_v6, %v3198_v22  ;;  %v1268_v28 = vrot.slane %v1258_v21, %v3188_v18 }
 0x1cf   : > { %2212 = vmatprep.subr.mxu1 %v2773_v0  ;;  %v738_v33 = vadd.f32 %v737_v30, %v655_v31 }
 0x1d0   : > { %v1290_v31 = vrot.slane %v1280_v25, %v3198_v22  ;;  %v1446_v25 = vld [vmem:[#allocation13 + $0x58] sm:$0xff] }
 0x1d1   : > { %2205 = vmatmul.mubr.f32.vlgmr.msra.gmra.mrb[2].mxu1 %v736_v29  ;;  %v927_v61 = vpop.f32.mrb[2].mxu0  ;;  %v1310_v29 = vrot.slane %v1245_v6, %v3249_v10  ;;  %v1441_v6 = vld [vmem:[#allocation13 + $0x30] sm:$0xff] }
 0x1d2   : > { %2213 = vmatpush3.xpose.msra.mxu1 %v834_v32  ;;  %2214 = vmatprep.mubr.msk.f32.mxu1 %vm2775_vm4, %v2773_v0  ;;  %v929_v63 = vpop.f32.mrb[3].mxu0  ;;  %v3231_v1 = vadd.f32 %v927_v61, %v845_v60  ;;  %v1439_v60 = vld [vmem:[#allocation13 + $0x20] sm:$0xff]  ;;  %v1440_v61 = vld [vmem:[#allocation13 + $0x28] sm:$0xff] }
 0x1d3   : > { %v3233_v2 = vadd.f32 %v929_v63, %v849_v62  ;;  %v1320_v37 = vrot.slane %v1310_v29, %v3249_v10  ;;  %v1457_v62 = vld [vmem:[#allocation13 + $0xb0] sm:$0xff]  ;;  %v1458_v63 = vld [vmem:[#allocation13 + $0xb8] sm:$0xff]  ;;  %v2250_v3 = vpack.c.bf16 %v1440_v61, %v1439_v60  ;;  %v1472_v60 = vld [vmem:[#allocation13 + $0x128] sm:$0xff] }
 0x1d4   : > { %2208 = vmatpush3.msra.mxu0 %v3231_v1  ;;  %v1246_v13 = vrot.slane %v3231_v1, 7  ;;  %v1299_v16 = vrot.slane %v3231_v1, 1  ;;  %v1295_v36 = vmul.f32 %v1290_v31, %v3231_v1  ;;  %v2252_v5 = vpack.c.bf16 %v1458_v63, %v1457_v62  ;;  %v1447_v31 = vld [vmem:[#allocation13 + $0x60] sm:$0xff]  ;;  %v1490_v61 = vld [vmem:[#allocation13 + $0x1b8] sm:$0xff] }
 0x1d5   : > { %2215 = vmatmul.mubr.f32.vlgmr.msra.gmra.mrb[4].mxu1 %v738_v33  ;;  %2217 = vmatprep.subr.mxu0 %v2773_v0  ;;  %v1247_v7 = vrot.slane %v3233_v2, 7  ;;  %v1300_v8 = vrot.slane %v3233_v2, 1  ;;  %v1296_v33 = vmul.f32 %v1294_v26, %v3233_v2  ;;  %v1463_v26 = vld [vmem:[#allocation13 + $0xe0] sm:$0xff]  ;;  %v1344_v62 = vld [vmem:[%s3499_s29 + $0x8] sm:$0x1f]  ;;  %v1346_v63 = vrot.slane %v3233_v2, 6 }
 0x1d6   : > { %v3270_v30 = vsel %vm1249_vm6, %v1246_v13, 0.0  ;;  %v3274_v32 = vsel %vm1303_vm7, %v1299_v16, 0.0  ;;  %v1443_v13 = vld [vmem:[#allocation13 + $0x40] sm:$0xff]  ;;  %v1461_v16 = vld [vmem:[#allocation13 + $0xd0] sm:$0xff] }
 0x1d7   : > { %v3255_v14 = vsel %vm1249_vm6, %v1247_v7, 0.0  ;;  %v3261_v23 = vsel %vm1303_vm7, %v1300_v8, 0.0  ;;  %v1273_v35 = vmul.f32 %v1268_v28, %v3270_v30  ;;  %v1325_v40 = vmul.f32 %v1320_v37, %v3274_v32  ;;  %v1442_v7 = vld [vmem:[#allocation13 + $0x38] sm:$0xff]  ;;  %v1459_v8 = vld [vmem:[#allocation13 + $0xc0] sm:$0xff] }
 0x1d8   : > { %v1274_v24 = vmul.f32 %v1272_v15, %v3255_v14  ;;  %v1326_v34 = vmul.f32 %v1324_v27, %v3261_v23  ;;  %v2254_v11 = vpack.c.bf16 %v1442_v7, %v1441_v6  ;;  %v2256_v12 = vpack.c.bf16 %v1460_v9, %v1459_v8  ;;  %v1444_v15 = vld [vmem:[#allocation13 + $0x48] sm:$0xff]  ;;  %v1483_v37 = vld [vmem:[#allocation13 + $0x180] sm:$0xff]  ;;  %v1473_v6 = vld [vmem:[#allocation13 + $0x130] sm:$0xff] }
 0x1d9   : > { %v1297_v39 = vadd.f32 %v1295_v36, %v1273_v35  ;;  %v2258_v20 = vpack.c.bf16 %v1444_v15, %v1443_v13  ;;  %v2260_v21 = vpack.c.bf16 %v1462_v19, %v1461_v16  ;;  %v1464_v27 = vld [vmem:[#allocation13 + $0xe8] sm:$0xff]  ;;  %v1474_v7 = vld [vmem:[#allocation13 + $0x138] sm:$0xff]  ;;  %v1491_v8 = vld [vmem:[#allocation13 + $0x1c0] sm:$0xff] }
 0x1da   : > { %v1298_v38 = vadd.f32 %v1296_v33, %v1274_v24  ;;  %v1445_v24 = vld [vmem:[#allocation13 + $0x50] sm:$0xff]  ;;  %v2264_v29 = vpack.c.bf16 %v1464_v27, %v1463_v26  ;;  %v1448_v33 = vld [vmem:[#allocation13 + $0x68] sm:$0xff]  ;;  %v2286_v15 = vpack.c.bf16 %v1474_v7, %v1473_v6  ;;  %v1475_v19 = vld [vmem:[#allocation13 + $0x140] sm:$0xff]  ;;  %v1384_v27 = vrot.slane %v1344_v62, %v3249_v10 }
 0x1db   : > { %v2262_v28 = vpack.c.bf16 %v1446_v25, %v1445_v24  ;;  %v1492_v9 = vld [vmem:[#allocation13 + $0x1c8] sm:$0xff]  ;;  %v1494_v24 = vld [vmem:[#allocation13 + $0x1d8] sm:$0xff]  ;;  %v1549_v6 = vld [vmem:[#allocation13 + $0x390] sm:$0xff] }
 0x1dc   : > { %v2288_v16 = vpack.c.bf16 %v1492_v9, %v1491_v8  ;;  %v1550_v7 = vld [vmem:[#allocation13 + $0x398] sm:$0xff] }
 0x1dd   : > { %v2340_v9 = vpack.c.bf16 %v1550_v7, %v1549_v6  ;;  %v1545_v7 = vld [vmem:[#allocation13 + $0x370] sm:$0xff] }
 0x2a4   : > { %v998_v41 = vpop.f32.mrb[2].mxu1 }
 0x2a5   : > { %v1002_v42 = vmul.f32 0.5, %v998_v41  ;;  %v2206_v43 = vpop.f32.mrb[3].mxu1  ;;  %v3282_v41 = vadd.f32 %v1326_v34, %v1298_v38  ;;  %v2266_v34 = vpack.c.bf16 %v1448_v33, %v1447_v31  ;;  %v1484_v38 = vld [vmem:[#allocation13 + $0x188] sm:$0xff]  ;;  %v3310_v31 = vadd.s32 2, %v3185_v17 }
 0x2a6   : > { %v1451_v43 = vld [vmem:[#allocation13 + $0x80] sm:$0xff] }
 0x2a7   : > { %v1004_v44 = vsel %vm1003_vm5, %v1002_v42, -inf  ;;  %vm1405_vm9 = vcmp.lt.s32.totalorder %v3310_v31, 8 }
 0x2a8   : > { %1005 = vmax.xlane.f32.xlu0 %v1004_v44  ;;  %v1154_v45 = vpop.f32.mrb[4].mxu1  ;;  %v1452_v44 = vld [vmem:[#allocation13 + $0x88] sm:$0xff] }
 0x2a9   : > { %v1158_v46 = vmul.f32 0.5, %v1154_v45  ;;  %v2216_v47 = vpop.f32.mrb[5].mxu1  ;;  %v1435_v45 = vld [vmem:[#allocation13] sm:$0xff] }
 0x2aa   : > { %v1436_v47 = vld [vmem:[#allocation13 + $0x8] sm:$0xff] }
 0x2ab   : > { %v1159_v48 = vsel %vm1003_vm5, %v1158_v46, -inf }
 0x2ac   : > { %1160 = vmax.xlane.f32.xlu0 %v1159_v48  ;;  %v1453_v48 = vld [vmem:[#allocation13 + $0x90] sm:$0xff] }
 0x335   : > { %v1006_v49 = vpop.xlane.xlu0 %1005 }
 0x336   : > { %v1007_v50 = vsub.f32 %v1002_v42, %v1006_v49  ;;  %v3284_v42 = vadd.f32 %v1325_v40, %v1297_v39  ;;  %v1454_v49 = vld [vmem:[#allocation13 + $0x98] sm:$0xff] }
 0x338   : > { %v1008_v51 = vmul.f32 1.442695, %v1007_v50  ;;  %v2242_v50 = vpack.c.bf16 %v1436_v47, %v1435_v45  ;;  %v1468_v45 = vld [vmem:[#allocation13 + $0x108] sm:$0xff]  ;;  %v1486_v47 = vld [vmem:[#allocation13 + $0x198] sm:$0xff] }
 0x339   : > { %v1161_v52 = vpop.xlane.xlu0 %1160 }
 0x33a   : > { %2472 = vpow2.f32 %v1008_v51  ;;  %v1162_v53 = vsub.f32 %v1158_v46, %v1161_v52  ;;  %v2240_v46 = vpack.c.bf16 %v1452_v44, %v1451_v43  ;;  %v2244_v51 = vpack.c.bf16 %v1454_v49, %v1453_v48  ;;  %v1437_v52 = vld [vmem:[#allocation13 + $0x10] sm:$0xff]  ;;  %v1467_v44 = vld [vmem:[#allocation13 + $0x100] sm:$0xff] }
 0x33b   : > { %v2272_v43 = vpack.c.bf16 %v1484_v38, %v1483_v37  ;;  %v2274_v49 = vpack.c.bf16 %v1468_v45, %v1467_v44  ;;  %v1496_v37 = vld [vmem:[#allocation13 + $0x1e8] sm:$0xff]  ;;  %v1479_v45 = vld [vmem:[#allocation13 + $0x160] sm:$0xff] }
 0x33c   : > { %v1163_v54 = vmul.f32 1.442695, %v1162_v53  ;;  %v1438_v53 = vld [vmem:[#allocation13 + $0x18] sm:$0xff]  ;;  %2241 = vmatprep.subr.bf16.mxu1 %v2240_v46  ;;  %v1485_v46 = vld [vmem:[#allocation13 + $0x190] sm:$0xff] }
 0x33d   : > { %2243 = vmatpush3.bf16.msra.mxu1 %v2242_v50 }
 0x33e   : > { %2474 = vpow2.f32 %v1163_v54  ;;  %v1455_v54 = vld [vmem:[#allocation13 + $0xa0] sm:$0xff]  ;;  %2245 = vmatprep.subr.bf16.mxu1 %v2244_v51  ;;  %v2276_v51 = vpack.c.bf16 %v1486_v47, %v1485_v46  ;;  %v1480_v46 = vld [vmem:[#allocation13 + $0x168] sm:$0xff]  ;;  %v1497_v47 = vld [vmem:[#allocation13 + $0x1f0] sm:$0xff] }
 0x344   : > { %v3218_v55 = vpop.eup %2472 }
 0x345   : > { %v1010_v56 = vsel %vm1003_vm5, %v3218_v55, 0.0 }
 0x346   : > { %1011 = vadd.xlane.f32.xlu1 %v1010_v56  ;;  %v1456_v56 = vld [vmem:[#allocation13 + $0xa8] sm:$0xff] }
 0x347   : > { %v2248_v59 = vpack.c.bf16 %v1456_v56, %v1455_v54  ;;  %v1488_v54 = vld [vmem:[#allocation13 + $0x1a8] sm:$0xff] }
 0x348   : > { %v3222_v57 = vpop.eup %2474 }
 0x349   : > { %v1165_v58 = vsel %vm1003_vm5, %v3222_v57, 0.0 }
 0x34a   : > { %1166 = vadd.xlane.f32.xlu1 %v1165_v58  ;;  %v2246_v58 = vpack.c.bf16 %v1438_v53, %v1437_v52  ;;  %v1469_v52 = vld [vmem:[#allocation13 + $0x110] sm:$0xff]  ;;  %v1487_v53 = vld [vmem:[#allocation13 + $0x1a0] sm:$0xff] }
 0x34c   : > { %2247 = vmatpush3.bf16.msra.mxu1 %v2246_v58  ;;  %v3295_v58 = vadd.s32 4294967294, %v3185_v17 }
 0x34d   : > { %2249 = vmatprep.subr.bf16.mxu1 %v2248_v59  ;;  %v1471_v59 = vld [vmem:[#allocation13 + $0x120] sm:$0xff] }
 0x34e   : > { %vm1348_vm8 = vcmp.ge.s32.totalorder %v3295_v58, 0 }
 0x34f   : > { %v1352_v13 = vsel %vm1348_vm8, %v1346_v63, 0.0  ;;  %v1532_v63 = vld [vmem:[#allocation13 + $0x308] sm:$0xff] }
 0x350   : > { %2251 = vmatpush3.bf16.msra.mxu1 %v2250_v3  ;;  %v2282_v3 = vpack.c.bf16 %v1472_v60, %v1471_v59 }
 0x351   : > { %2253 = vmatprep.subr.bf16.mxu1 %v2252_v5 }
 0x354   : > { %2255 = vmatpush3.bf16.msra.mxu1 %v2254_v11  ;;  %v1360_v11 = vrot.slane %v1344_v62, %v3188_v18 }
 0x355   : > { %2257 = vmatprep.subr.bf16.mxu1 %v2256_v12  ;;  %v1372_v12 = vrot.slane %v1344_v62, %v3198_v22 }
 0x356   : > { %v1362_v25 = vmul.f32 %v1360_v11, %v1352_v13  ;;  %v1533_v11 = vld [vmem:[#allocation13 + $0x310] sm:$0xff] }
 0x357   : > { %v1374_v26 = vmul.f32 %v1372_v12, %v3255_v14  ;;  %v1534_v12 = vld [vmem:[#allocation13 + $0x318] sm:$0xff] }
 0x358   : > { %2259 = vmatpush3.bf16.msra.mxu1 %v2258_v20  ;;  %v1476_v20 = vld [vmem:[#allocation13 + $0x148] sm:$0xff] }
 0x359   : > { %2261 = vmatprep.subr.bf16.mxu1 %v2260_v21  ;;  %v1493_v21 = vld [vmem:[#allocation13 + $0x1d0] sm:$0xff]  ;;  %v1376_v38 = vadd.f32 %v1374_v26, %v1362_v25  ;;  %v1345_v25 = vrot.slane %v3231_v1, 6 }
 0x35a   : > { %v2292_v33 = vpack.c.bf16 %v1494_v24, %v1493_v21  ;;  %v1535_v21 = vld [vmem:[#allocation13 + $0x320] sm:$0xff]  ;;  %v1536_v24 = vld [vmem:[#allocation13 + $0x328] sm:$0xff]  ;;  %v1553_v26 = vld [vmem:[#allocation13 + $0x3b0] sm:$0xff] }
 0x35c   : > { %2263 = vmatpush3.bf16.msra.mxu1 %v2262_v28  ;;  %v1391_v28 = vsub.s32 3, %v3185_v17  ;;  %v1561_v17 = vld [vmem:[#allocation13 + $0x3f0] sm:$0xff] }
 0x35d   : > { %2265 = vmatprep.subr.bf16.mxu1 %v2264_v29  ;;  %v2290_v29 = vpack.c.bf16 %v1476_v20, %v1475_v19  ;;  %v2342_v19 = vpack.c.bf16 %v1534_v12, %v1533_v11 }
 0x35e   : > { %v1396_v14 = vrot.slane %v1344_v62, %v1391_v28 }
 0x360   : > { %2267 = vmatpush3.bf16.msra.mxu1 %v2266_v34  ;;  %v1477_v34 = vld [vmem:[#allocation13 + $0x150] sm:$0xff] }
 0x3d3   : > { %v1012_v35 = vpop.xlane.xlu1 %1011 }
 0x3d4   : > { %2476 = vrcp.f32 %v1012_v35  ;;  %v1478_v35 = vld [vmem:[#allocation13 + $0x158] sm:$0xff] }
 0x3d7   : > { %v1167_v36 = vpop.xlane.xlu1 %1166 }
 0x3d8   : > { %2478 = vrcp.f32 %v1167_v36  ;;  %v1495_v36 = vld [vmem:[#allocation13 + $0x1e0] sm:$0xff] }
 0x3d9   : > { %v2296_v44 = vpack.c.bf16 %v1496_v37, %v1495_v36  ;;  %v1538_v36 = vld [vmem:[#allocation13 + $0x338] sm:$0xff] }
 0x3de   : > { %v2477_v39 = vpop.eup %2476 }
 0x3df   : > { %v1014_v40 = vmul.f32 %v2477_v39, %v3218_v55  ;;  %v1470_v55 = vld [vmem:[#allocation13 + $0x118] sm:$0xff]  ;;  %v1386_v39 = vmul.f32 %v1384_v27, %v3233_v2 }
 0x3e0   : > { %v2278_v56 = vpack.c.bf16 %v1470_v55, %v1469_v52  ;;  %v1554_v27 = vld [vmem:[#allocation13 + $0x3b8] sm:$0xff] }
 0x3e1   : > { %2210 = vmatmul.mubr.msk.f32.vlgmr.msra.gmra.mrb[4].mxu0 %vm1003_vm5, %v1014_v40  ;;  %v1402_v40 = vrot.slane %v3233_v2, 2 }
 0x3e2   : > { %v2479_v48 = vpop.eup %2478  ;;  %2218 = vmatpush3.msra.mxu0 %v3233_v2  ;;  %2219 = vmatprep.mubr.msk.f32.mxu0 %vm2775_vm4, %v2773_v0  ;;  %v2280_v0 = vpack.c.bf16 %v1488_v54, %v1487_v53  ;;  %v1481_v53 = vld [vmem:[#allocation13 + $0x170] sm:$0xff]  ;;  %v1482_v54 = vld [vmem:[#allocation13 + $0x178] sm:$0xff] }
 0x3e3   : > { %v1169_v50 = vmul.f32 %v2479_v48, %v3222_v57  ;;  %2273 = vmatprep.subr.bf16.mxu0 %v2272_v43  ;;  %v1489_v57 = vld [vmem:[#allocation13 + $0x1b0] sm:$0xff]  ;;  %v2294_v43 = vpack.c.bf16 %v1478_v35, %v1477_v34  ;;  %v1498_v48 = vld [vmem:[#allocation13 + $0x1f8] sm:$0xff]  ;;  %v1408_v52 = vsel %vm1405_vm9, %v1402_v40, 0.0  ;;  %v2348_v34 = vpack.c.bf16 %v1554_v27, %v1553_v26  ;;  %v1556_v40 = vld [vmem:[#allocation13 + $0x3c8] sm:$0xff] }
 0x3e4   : > { %v2284_v5 = vpack.c.bf16 %v1490_v61, %v1489_v57  ;;  %v2300_v55 = vpack.c.bf16 %v1498_v48, %v1497_v47  ;;  %v3324_v57 = vld [vmem:[%s3500_s15] sm:$0x3] }
 0x3e5   : > { %2220 = vmatmul.mubr.msk.f32.vlgmr.msra.gmra.mrb[6].mxu0 %vm1003_vm5, %v1169_v50  ;;  %v1398_v50 = vmul.f32 %v1396_v14, %v3261_v23  ;;  %v2302_v23 = vpack.c.bf16 %v1482_v54, %v1481_v53  ;;  %v1537_v35 = vld [vmem:[#allocation13 + $0x330] sm:$0xff]  ;;  %v1555_v14 = vld [vmem:[#allocation13 + $0x3c0] sm:$0xff] }
 0x3e6   : > { %2275 = vmatpush3.bf16.msra.mxu0 %v2274_v49  ;;  %1704 = vmatprep.mubr.f32.mxu0 %v3233_v2  ;;  %v1388_v49 = vadd.f32 %v1386_v39, %v1376_v38  ;;  %v2298_v2 = vpack.c.bf16 %v1480_v46, %v1479_v45  ;;  %v1351_v39 = vsel %vm1348_vm8, %v1345_v25, 0.0  ;;  %v1539_v45 = vld [vmem:[#allocation13 + $0x340] sm:$0xff]  ;;  %v1540_v46 = vld [vmem:[#allocation13 + $0x348] sm:$0xff] }
 0x3e7   : > { %2277 = vmatprep.subr.bf16.mxu0 %v2276_v51  ;;  %v1416_v51 = vrot.slane %v1344_v62, %v3239_v4  ;;  %v1531_v62 = vld [vmem:[#allocation13 + $0x300] sm:$0xff]  ;;  %v1516_v25 = vld [vmem:[#allocation13 + $0x288] sm:$0xff] }
 0x3e8   : > { %v1400_v59 = vadd.f32 %v1398_v50, %v1388_v49  ;;  %v2338_v8 = vpack.c.bf16 %v1532_v63, %v1531_v62  ;;  %v1557_v50 = vld [vmem:[#allocation13 + $0x3d0] sm:$0xff] }
 0x3e9   : > { %v1418_v60 = vmul.f32 %v1416_v51, %v1408_v52  ;;  %v1558_v51 = vld [vmem:[#allocation13 + $0x3d8] sm:$0xff]  ;;  %v2354_v52 = vpack.c.bf16 %v1540_v46, %v1539_v45  ;;  %v1519_v46 = vld [vmem:[#allocation13 + $0x2a0] sm:$0xff] }
 0x3ea   : > { %2279 = vmatpush3.bf16.msra.mxu0 %v2278_v56  ;;  %v1547_v56 = vld [vmem:[#allocation13 + $0x380] sm:$0xff]  ;;  %v2356_v58 = vpack.c.bf16 %v1558_v51, %v1557_v50  ;;  %v1504_v50 = vld [vmem:[#allocation13 + $0x228] sm:$0xff]  ;;  %v1521_v51 = vld [vmem:[#allocation13 + $0x2b0] sm:$0xff] }
 0x3eb   : > { %2281 = vmatprep.subr.bf16.mxu0 %v2280_v0  ;;  %v1548_v0 = vld [vmem:[#allocation13 + $0x388] sm:$0xff] }
 0x3ec   : > { %v2336_v61 = vpack.c.bf16 %v1548_v0, %v1547_v56  ;;  %v1401_v0 = vrot.slane %v3231_v1, 2 }
 0x3ee   : > { %2283 = vmatpush3.bf16.msra.mxu0 %v2282_v3  ;;  %v1420_v3 = vadd.f32 %v1418_v60, %v1400_v59  ;;  %v1559_v59 = vld [vmem:[#allocation13 + $0x3e0] sm:$0xff] }
 0x3ef   : > { %2285 = vmatprep.subr.bf16.mxu0 %v2284_v5  ;;  %v1430_v5 = vrot.slane %v3324_v57, %v3198_v22 }
 0x3f1   : > { %v1434_v13 = vadd.f32 %v1430_v5, %v1420_v3  ;;  %v1407_v5 = vsel %vm1405_vm9, %v1401_v0, 0.0 }
 0x3f2   : > { %2287 = vmatpush3.bf16.msra.mxu0 %v2286_v15  ;;  %v1551_v15 = vld [vmem:[#allocation13 + $0x3a0] sm:$0xff] }
 0x3f3   : > { %2289 = vmatprep.subr.bf16.mxu0 %v2288_v16  ;;  %v1552_v16 = vld [vmem:[#allocation13 + $0x3a8] sm:$0xff] }
 0x3f4   : > { %v2344_v20 = vpack.c.bf16 %v1552_v16, %v1551_v15  ;;  %v1466_v15 = vld [vmem:[#allocation13 + $0xf8] sm:$0xff] }
 0x3f6   : > { %2291 = vmatpush3.bf16.msra.mxu0 %v2290_v29  ;;  %v1343_v29 = vld [vmem:[%s3499_s29] sm:$0x1f] }
 0x3f7   : > { %2293 = vmatprep.subr.bf16.mxu0 %v2292_v33  ;;  %v2346_v33 = vpack.c.bf16 %v1536_v24, %v1535_v21  ;;  %v1356_v37 = vrot.slane %v1343_v29, %v3188_v18  ;;  %v1368_v38 = vrot.slane %v1343_v29, %v3198_v22  ;;  %v1380_v49 = vrot.slane %v1343_v29, %v3249_v10  ;;  %v1515_v24 = vld [vmem:[#allocation13 + $0x280] sm:$0xff] }
 0x3f8   : > { %v1392_v56 = vrot.slane %v1343_v29, %v1391_v28  ;;  %v1412_v3 = vrot.slane %v1343_v29, %v3239_v4  ;;  %v1562_v28 = vld [vmem:[#allocation13 + $0x3f8] sm:$0xff]  ;;  %v2304_v26 = vpack.c.bf16 %v1516_v25, %v1515_v24  ;;  %v1499_v29 = vld [vmem:[#allocation13 + $0x200] sm:$0xff] }
 0x3f9   : > { %v1361_v47 = vmul.f32 %v1356_v37, %v1351_v39  ;;  %v1373_v48 = vmul.f32 %v1368_v38, %v3270_v30  ;;  %v1385_v54 = vmul.f32 %v1380_v49, %v3231_v1  ;;  %v1560_v30 = vld [vmem:[#allocation13 + $0x3e8] sm:$0xff]  ;;  %v2364_v6 = vpack.c.bf16 %v1562_v28, %v1561_v17  ;;  %v1518_v37 = vld [vmem:[#allocation13 + $0x298] sm:$0xff] }
 0x3fa   : > { %2295 = vmatpush3.bf16.msra.mxu0 %v2294_v43  ;;  %v2350_v43 = vpack.c.bf16 %v1538_v36, %v1537_v35  ;;  %v2360_v60 = vpack.c.bf16 %v1560_v30, %v1559_v59  ;;  %v1397_v63 = vmul.f32 %v1392_v56, %v3274_v32  ;;  %v1417_v11 = vmul.f32 %v1412_v3, %v1407_v5  ;;  %v1517_v36 = vld [vmem:[#allocation13 + $0x290] sm:$0xff]  ;;  %v1507_v59 = vld [vmem:[#allocation13 + $0x240] sm:$0xff]  ;;  %v1508_v30 = vld [vmem:[#allocation13 + $0x248] sm:$0xff] }
 0x3fb   : > { %2297 = vmatprep.subr.bf16.mxu0 %v2296_v44  ;;  %v2352_v44 = vpack.c.bf16 %v1556_v40, %v1555_v14  ;;  %v1375_v53 = vadd.f32 %v1373_v48, %v1361_v47  ;;  %v1426_v32 = vrot.slane %v3324_v57, %v3188_v18  ;;  %v3352_v57 = vld [vmem:[%s3501_s26] sm:$0x3]  ;;  %v2308_v14 = vpack.c.bf16 %v1518_v37, %v1517_v36  ;;  %v1520_v47 = vld [vmem:[#allocation13 + $0x2a8] sm:$0xff]  ;;  %v1527_v3 = vld [vmem:[#allocation13 + $0x2e0] sm:$0xff] }
 0x3fc   : > { %v1338_v35 = vrot.slane %v3352_v57, %v3198_v22  ;;  %v1501_v40 = vld [vmem:[#allocation13 + $0x210] sm:$0xff]  ;;  %v2312_v49 = vpack.c.bf16 %v1520_v47, %v1519_v46  ;;  %v1503_v22 = vld [vmem:[#allocation13 + $0x220] sm:$0xff]  ;;  %v1528_v5 = vld [vmem:[#allocation13 + $0x2e8] sm:$0xff] }
 0x3fd   : > { %v1387_v62 = vadd.f32 %v1385_v54, %v1375_v53  ;;  %v1506_v53 = vld [vmem:[#allocation13 + $0x238] sm:$0xff]  ;;  %v1523_v54 = vld [vmem:[#allocation13 + $0x2c0] sm:$0xff]  ;;  %v2328_v28 = vpack.c.bf16 %v1528_v5, %v1527_v3 }
 0x3fe   : > { %2299 = vmatpush3.bf16.msra.mxu0 %v2298_v2  ;;  %v1541_v2 = vld [vmem:[#allocation13 + $0x350] sm:$0xff]  ;;  %v1342_v45 = vadd.f32 %v1338_v35, %v3282_v41  ;;  %v1524_v41 = vld [vmem:[#allocation13 + $0x2c8] sm:$0xff] }
 0x3ff   : > { %2301 = vmatprep.subr.bf16.mxu0 %v2300_v55  ;;  %v1542_v55 = vld [vmem:[#allocation13 + $0x358] sm:$0xff]  ;;  %v2320_v0 = vpack.c.bf16 %v1524_v41, %v1523_v54 }
 0x400   : > { %v2358_v10 = vpack.c.bf16 %v1542_v55, %v1541_v2  ;;  %v1505_v55 = vld [vmem:[#allocation13 + $0x230] sm:$0xff] }
 0x401   : > { %v2318_v56 = vpack.c.bf16 %v1506_v53, %v1505_v55 }
 0x402   : > { %2303 = vmatpush3.bf16.msra.mxu0 %v2302_v23  ;;  %v1543_v23 = vld [vmem:[#allocation13 + $0x360] sm:$0xff] }
 0x403   : > { %2337 = vmatprep.subr.bf16.mxu0 %v2336_v61  ;;  %v1544_v61 = vld [vmem:[#allocation13 + $0x368] sm:$0xff] }
 0x405   : > { %1705 = vmatmul.mubr.f32.vlgmr.msra.gmra.mrb[8].mxu0 %v3231_v1  ;;  %v2362_v1 = vpack.c.bf16 %v1544_v61, %v1543_v23  ;;  %v2322_v23 = vpack.c.bf16 %v1508_v30, %v1507_v59 }
 0x406   : > { %2339 = vmatpush3.bf16.msra.mxu0 %v2338_v8  ;;  %1844 = vmatprep.mubr.f32.mxu0 %v1434_v13  ;;  %v1546_v8 = vld [vmem:[#allocation13 + $0x378] sm:$0xff]  ;;  %v1465_v13 = vld [vmem:[#allocation13 + $0xf0] sm:$0xff] }
 0x407   : > { %2341 = vmatprep.subr.bf16.mxu0 %v2340_v9  ;;  %v1399_v9 = vadd.f32 %v1397_v63, %v1387_v62  ;;  %v2366_v12 = vpack.c.bf16 %v1546_v8, %v1545_v7  ;;  %v2268_v16 = vpack.c.bf16 %v1466_v15, %v1465_v13  ;;  %v1509_v62 = vld [vmem:[#allocation13 + $0x250] sm:$0xff]  ;;  %v1510_v63 = vld [vmem:[#allocation13 + $0x258] sm:$0xff] }
 0x408   : > { %v2326_v17 = vpack.c.bf16 %v1510_v63, %v1509_v62  ;;  %v1529_v7 = vld [vmem:[#allocation13 + $0x2f0] sm:$0xff]  ;;  %v1530_v8 = vld [vmem:[#allocation13 + $0x2f8] sm:$0xff] }
 0x409   : > { %v1419_v4 = vadd.f32 %v1417_v11, %v1399_v9  ;;  %2269 = vmatprep.subr.bf16.mxu1 %v2268_v16  ;;  %v2332_v11 = vpack.c.bf16 %v1530_v8, %v1529_v7 }
 0x40a   : > { %2343 = vmatpush3.bf16.msra.mxu0 %v2342_v19  ;;  %v1449_v19 = vld [vmem:[#allocation13 + $0x70] sm:$0xff] }
 0x40b   : > { %2345 = vmatprep.subr.bf16.mxu0 %v2344_v20  ;;  %v1433_v31 = vadd.f32 %v1426_v32, %v1419_v4  ;;  %v1450_v20 = vld [vmem:[#allocation13 + $0x78] sm:$0xff] }
 0x40c   : > { %v2270_v21 = vpack.c.bf16 %v1450_v20, %v1449_v19  ;;  %v1514_v32 = vld [vmem:[#allocation13 + $0x278] sm:$0xff] }
 0x40e   : > { %2347 = vmatpush3.bf16.msra.mxu0 %v2346_v33  ;;  %2271 = vmatpush3.bf16.msra.mxu1 %v2270_v21  ;;  %v1500_v33 = vld [vmem:[#allocation13 + $0x208] sm:$0xff] }
 0x40f   : > { %2349 = vmatprep.subr.bf16.mxu0 %v2348_v34  ;;  %2305 = vmatprep.subr.bf16.mxu1 %v2304_v26  ;;  %v2306_v38 = vpack.c.bf16 %v1500_v33, %v1499_v29  ;;  %v2049_v26 = vld [vmem:[%s3502_s27] ss:$0 sm:$0xff] }
 0x412   : > { %2351 = vmatpush3.bf16.msra.mxu0 %v2350_v43  ;;  %v1502_v43 = vld [vmem:[#allocation13 + $0x218] sm:$0xff] }
 0x413   : > { %2353 = vmatprep.subr.bf16.mxu0 %v2352_v44  ;;  %v2310_v48 = vpack.c.bf16 %v1502_v43, %v1501_v40 }
 0x416   : > { %2355 = vmatpush3.bf16.msra.mxu0 %v2354_v52  ;;  %v1522_v52 = vld [vmem:[#allocation13 + $0x2b8] sm:$0xff] }
 0x417   : > { %2357 = vmatprep.subr.bf16.mxu0 %v2356_v58  ;;  %v2314_v58 = vpack.c.bf16 %v1504_v50, %v1503_v22  ;;  %v2316_v2 = vpack.c.bf16 %v1522_v52, %v1521_v51 }
 0x41a   : > { %2359 = vmatpush3.bf16.msra.mxu0 %v2358_v10  ;;  %v1525_v10 = vld [vmem:[#allocation13 + $0x2d0] sm:$0xff] }
 0x41b   : > { %2361 = vmatprep.subr.bf16.mxu0 %v2360_v60  ;;  %v1526_v60 = vld [vmem:[#allocation13 + $0x2d8] sm:$0xff] }
 0x41c   : > { %v2324_v61 = vpack.c.bf16 %v1526_v60, %v1525_v10 }
 0x41e   : > { %2363 = vmatpush3.bf16.msra.mxu0 %v2362_v1  ;;  %v1511_v1 = vld [vmem:[#allocation13 + $0x260] sm:$0xff] }
 0x41f   : > { %2365 = vmatprep.subr.bf16.mxu0 %v2364_v6  ;;  %v1512_v6 = vld [vmem:[#allocation13 + $0x268] sm:$0xff] }
 0x420   : > { %v2330_v9 = vpack.c.bf16 %v1512_v6, %v1511_v1 }
 0x422   : > { %2367 = vmatpush3.bf16.msra.mxu0 %v2366_v12  ;;  %v1513_v12 = vld [vmem:[#allocation13 + $0x270] sm:$0xff] }
 0x423   : > { %v2334_v4 = vpack.c.bf16 %v1514_v32, %v1513_v12 }
 0x425   : > { %1845 = vmatmul.mubr.f32.vlgmr.msra.gmra.mrb[10].mxu0 %v1433_v31  ;;  %v1334_v31 = vrot.slane %v3352_v57, %v3188_v18 }
 0x427   : > { %v1341_v15 = vadd.f32 %v1334_v31, %v3284_v42 }
 0x4b4   : > { %v1084_v27 = vpop.f32.mrb[4].mxu0 }
 0x4b5   : > { %v2211_v34 = vpop.f32.mrb[5].mxu0 }
 0x4b8   : > { %v1239_v39 = vpop.f32.mrb[6].mxu0 }
 0x4b9   : > { %v2221_v44 = vpop.f32.mrb[7].mxu0  ;;  %1634 = vmatprep.mubr.f32.mxu1 %v1239_v39 }
 0x4ba   : > { %1635 = vmatmul.mubr.f32.vlgmr.msra.gmra.mrb[6].mxu1 %v1084_v27 }
 0x4bb   : > { %2307 = vmatpush3.bf16.msra.mxu1 %v2306_v38  ;;  %1774 = vmatprep.mubr.f32.mxu1 %v1342_v45 }
 0x4bc   : > { %2309 = vmatprep.subr.bf16.mxu1 %v2308_v14 }
 0x4bf   : > { %2311 = vmatpush3.bf16.msra.mxu1 %v2310_v48 }
 0x4c0   : > { %2313 = vmatprep.subr.bf16.mxu1 %v2312_v49 }
 0x4c3   : > { %2315 = vmatpush3.bf16.msra.mxu1 %v2314_v58 }
 0x4c4   : > { %2317 = vmatprep.subr.bf16.mxu1 %v2316_v2 }
 0x4c7   : > { %2319 = vmatpush3.bf16.msra.mxu1 %v2318_v56 }
 0x4c8   : > { %2321 = vmatprep.subr.bf16.mxu1 %v2320_v0 }
 0x4cb   : > { %2323 = vmatpush3.bf16.msra.mxu1 %v2322_v23 }
 0x4cc   : > { %2325 = vmatprep.subr.bf16.mxu1 %v2324_v61 }
 0x4cf   : > { %2327 = vmatpush3.bf16.msra.mxu1 %v2326_v17 }
 0x4d0   : > { %2329 = vmatprep.subr.bf16.mxu1 %v2328_v28 }
 0x4d3   : > { %2331 = vmatpush3.bf16.msra.mxu1 %v2330_v9 }
 0x4d4   : > { %2333 = vmatprep.subr.bf16.mxu1 %v2332_v11 }
 0x4d7   : > { %2335 = vmatpush3.bf16.msra.mxu1 %v2334_v4 }
 0x4d8   : > { %v2129_v13 = vpop.f32.mrb[8].mxu0 }
 0x4d9   : > { %v2130_v16 = vpop.f32.mrb[9].mxu0 }
 0x4da   : > { %v2131_v19 = vadd.f32 %v2130_v16, %v2129_v13  ;;  %1775 = vmatmul.mubr.f32.vlgmr.msra.gmra.mrb[8].mxu1 %v1341_v15 }
 0x4f8   : > { %v2199_v20 = vpop.f32.mrb[10].mxu0 }
 0x4f9   : > { %v2200_v21 = vpop.f32.mrb[11].mxu0 }
 0x4fa   : > { %v2201_v24 = vadd.f32 %v2200_v21, %v2199_v20 }
 0x58d   : > { %v2094_v25 = vpop.f32.mrb[6].mxu1 }
 0x58e   : > { %v2095_v18 = vpop.f32.mrb[7].mxu1 }
 0x58f   : > { %v2096_v57 = vadd.f32 %v2095_v18, %v2094_v25 }
 0x591   : > { %v1637_v27 = vadd.f32 %v2096_v57, %v2049_v26 }
 0x593   : > { %v1707_v29 = vadd.f32 %v2131_v19, %v1637_v27 }
 0x5ad   : > { %v2164_v42 = vpop.f32.mrb[8].mxu1 }
 0x5ae   : > { %v2165_v33 = vpop.f32.mrb[9].mxu1 }
 0x5af   : > { %v2166_v34 = vadd.f32 %v2165_v33, %v2164_v42 }
 0x5b1   : > { %v1777_v35 = vadd.f32 %v2166_v34, %v1707_v29 }
 0x5b3   : > { %v1847_v36 = vadd.f32 %v2201_v24, %v1777_v35 }
 0x5b5   : > { %1850 = vst [vmem:[%s638_s18] sm:$0xff] %v1847_v36 }
 0x5b6   : > { %2695 = shalt.err (!%p2692_p4)
}
 0x5b7   : > { %s2696_s30 = scalar_lea.hbm %s3368_s9, 128  ;;  %s2700_s12 = scalar_lea.hbm %s3504_s11, 256 }
 0x5b8   : > { %p2697_p10 = scmp.ne.s32.totalorder %s3368_s9, %s2696_s30  ;;  %p2701_p12 = scmp.lt.u32.totalorder %s3368_s9, %s3504_s11 }
 0x5b9   : > { %p2702_p0 = scmp.lt.u32.totalorder %s2700_s12, %s2696_s30  ;;  %p2704_p9 = scmp.lt.u32.totalorder %s2696_s30, %s3368_s9 }
 0x5ba   : > { %p2698_p3 = pnand %p2697_p10, %p3505_p13 }
 0x5bb   : > { %p2703_p7 = por %p2702_p0, %p2701_p12 }
 0x5bc   : > { %p2699_p8 = pneg %p2698_p3 }
 0x5bd   : > { %p2705_p11 = por %p2704_p9, %p2703_p7 }
 0x5bf   : > { %p2706_p1 = pnand %p2705_p11, %p2699_p8 }
 0x5c1   : > { %2709 = shalt.err (!%p2706_p1)
}
 0x5c2   : > { %2390 = dma.vmem_to_hbm [thread:$0]  (%p3505_p13), %s3370_s22, 128, %s3368_s9, %s1852_s10  }
 0x5c3 PF: > { %s3506_s26 = sld [smem:[#allocation20_spill]]  ;;  %s3507_s21 = sld [smem:[#allocation25_spill]] }
 0x5c4   : > { %s3508_s17 = sld [smem:[#allocation21_spill]] }
 0x5c9   : > { %s1877_s27 = sand.u32 1, %s3506_s26   ;;  %p3509_p6 = scmp.ne.s32.totalorder %s3507_s21, 0 }
 0x5ca   : > { %p3510_p5 = scmp.ge.s32.totalorder %s3508_s17, 2  ;;  %s1878_s7 = scalar_lea.sflag [#allocation4], %s1877_s27 }
 0x5cc   : > { %p2416_p2 = pnand %p3510_p5, %p3509_p6 }
 0x5ce   : > { %2743 = dma.done.wait (!%p2416_p2), %s1878_s7, 128  }
 0x5cf   : > { %2745 = vsyncadd (!%p2416_p2), %s1878_s7, 4294967168  ;;  %s3511_s21 = sld [smem:[#allocation22_spill]]  ;;  %s3512_s14 = sld [smem:[#allocation23_spill]] }
 0x5d0   : > { %s3513_s18 = smov %s2752_s19  ;;  %s3514_s19 = smov %s2756_s20 }
 0x5d5   : > { %p33_p4 = scmp.ge.s32.totalorder %s3511_s21, 4   ;;  %s3515_s20 = smov %s3512_s14 }
 0x5d7   :  { %35 = sbr.rel (!%p33_p4) target bundleno = 21 (0x15), region = 165 }
 0x5de   :  { %1883 = vsyncpa [#allocation3], 1 }
 0x5df   :  { %1885 = vsyncpa [#allocation3 + $0x1], 1 }
 0x5e0   :  { %1886 = vsyncpa [#allocation6], 1 }
 0x5e1   :  { %1888 = vsyncpa [#allocation6 + $0x1], 1 }
 0x5e2   :  { %1889 = vsyncpa [#allocation9], 1 }
 0x5e3   :  { %1890 = vsyncpa [#allocation12], 1 }
 0x5e4   :  { %1891 = vsyncpa [#allocation4], 1 }
 0x5e5   :  { %1893 = vsyncpa [#allocation4 + $0x1], 1 }

</bundles_post_ra>
